<compile_context>
chip_gen: v7x
topology: tpu7x:2x2x1
jax: 0.10.0
libtpu: 0.0.40
codegen_flags: <defaults>
</compile_context>

<pallas_src>
import math

import jax
import jax.numpy as jnp
from jax.experimental import pallas as pl
from jax.experimental.pallas import tpu as pltpu

TIMESTEPS = 50
B, C, H, W = 2, 4, 16, 16
D = C * H * W            # 1024, lane-dense
HID = 256                # hidden width of the synthetic denoiser (fills 256-wide MXU)
N_CLASSES = 10
CLS_PAD = 128            # one-hot classes live in 128 lanes
TEMB = 128               # sinusoidal time-embedding width
KCAT = D + CLS_PAD + TEMB  # 1280 rows of the concatenated first-layer weight
P_UNCOND = 0.1
META_W = 8               # per-row scalars packed as (B, 8) f32
MAX_TILE_B = 512         # batch-tile cap (sized for v7x 64 MiB VMEM)


# ----------------------------------------------------------------------------
# Diffusion buffers (matches linear_beta_schedule(timesteps, beta_end=0.2))
# ----------------------------------------------------------------------------
def make_diffusion_buffers(timesteps, beta_start=1e-4, beta_end=0.2):
    betas = jnp.linspace(beta_start, beta_end, timesteps, dtype=jnp.float32)
    alphas = 1.0 - betas
    alphas_cumprod = jnp.cumprod(alphas)
    return {
        "betas": betas,
        "alphas_cumprod": alphas_cumprod,
        "sqrt_alphas_cumprod": jnp.sqrt(alphas_cumprod),
        "sqrt_one_minus_alphas_cumprod": jnp.sqrt(1.0 - alphas_cumprod),
    }


# ----------------------------------------------------------------------------
# Synthetic denoiser parameters.  The three input projections are concatenated
# along K (w_cat) so the kernel can slice them statically out of one resident
# VMEM buffer.  Weights stored bf16 (MXU operands); biases f32.
# ----------------------------------------------------------------------------
def make_model_params(key):
    k1, k2, k3, k4 = jax.random.split(key, 4)
    w1 = jax.random.normal(k1, (D, HID), jnp.float32) * (1.0 / jnp.sqrt(D))
    wc = jax.random.normal(k2, (CLS_PAD, HID), jnp.float32) * 0.05
    wt = jax.random.normal(k3, (TEMB, HID), jnp.float32) * 0.05
    w2 = jax.random.normal(k4, (HID, D), jnp.float32) * (1.0 / jnp.sqrt(HID))
    return {
        "w_cat": jnp.concatenate([w1, wc, wt], axis=0).astype(jnp.bfloat16),  # (1280, 256)
        "b1": jnp.zeros((1, HID), jnp.float32),
        "w2": w2.astype(jnp.bfloat16),                                        # (256, 1024)
        "b2": jnp.zeros((1, D), jnp.float32),
    }


# ----------------------------------------------------------------------------
# Pallas kernel: one batch tile.
#   q_sample + in-kernel class one-hot + in-kernel sinusoidal time embedding
#   + MLP denoiser (bf16 MXU, f32 acc) + smooth_l1 partial sums.
# ----------------------------------------------------------------------------
def diffusion_loss_kernel(x_ref, noise_ref, meta_ref,
                          wcat_ref, b1_ref, w2_ref, b2_ref,
                          out_ref):
    f32 = jnp.float32
    bf16 = jnp.bfloat16

    meta = meta_ref[...]                       # (tb, 8) f32 — one tiny load
    sac = meta[:, 0:1]                         # sqrt(alphas_cumprod)_t
    somac = meta[:, 1:2]                       # sqrt(1 - alphas_cumprod)_t
    t_col = meta[:, 2:3]                       # timestep (float)
    cid = meta[:, 3:4]                         # class id (float)
    cmask = meta[:, 4:5]                       # Bernoulli(1 - p_uncond) context mask
    valid = meta[:, 5:6]                       # 1.0 for real rows, 0.0 for batch padding

    tb = x_ref.shape[0]
    noise = noise_ref[...]

    # q_sample: x_noisy = sac_t * x_start + somac_t * noise   (f32 VPU)
    x_noisy = sac * x_ref[...] + somac * noise

    # Masked class one-hot built in-kernel (iota + compare + select).
    lane_c = jax.lax.broadcasted_iota(jnp.int32, (tb, CLS_PAD), 1).astype(f32)
    cls = jnp.where(lane_c == cid, cmask, 0.0)

    # Sinusoidal time embedding built in-kernel: lanes [0:64) = sin, [64:128) = cos.
    half = TEMB // 2
    lane_t = jax.lax.broadcasted_iota(jnp.int32, (tb, TEMB), 1)
    j = jnp.where(lane_t < half, lane_t, lane_t - half).astype(f32)
    freq = jnp.exp((-math.log(10000.0) / half) * j)
    ang = t_col * freq
    temb = jnp.where(lane_t < half, jnp.sin(ang), jnp.cos(ang))

    # Hidden layer: three accumulated dots against static slices of the
    # resident concatenated weight (bf16-aligned row offsets 0/1024/1152).
    h = jnp.dot(x_noisy.astype(bf16), wcat_ref[0:D, :],
                preferred_element_type=f32)
    h += jnp.dot(cls.astype(bf16), wcat_ref[D:D + CLS_PAD, :],
                 preferred_element_type=f32)
    h += jnp.dot(temb.astype(bf16), wcat_ref[D + CLS_PAD:KCAT, :],
                 preferred_element_type=f32)
    h = jnp.maximum(h + b1_ref[...], 0.0)

    pred = jnp.dot(h.astype(bf16), w2_ref[...],
                   preferred_element_type=f32) + b2_ref[...]

    # F.smooth_l1_loss(noise, predicted_noise), beta=1.0; padded rows masked out.
    d = noise - pred
    ad = jnp.abs(d)
    per_elem = jnp.where(ad < 1.0, 0.5 * d * d, ad - 0.5) * valid

    # Lane-dense per-tile partial sums: fold rows down to an (8, D) slab.
    if tb == 8:
        partial8 = per_elem
    else:
        partial8 = jnp.sum(per_elem.reshape(tb // 8, 8, D), axis=0)
    out_ref[0] = partial8


def _round_up(n, m):
    return (n + m - 1) // m * m


def _pallas_loss(x_flat, noise_flat, meta, params, true_batch):
    b = x_flat.shape[0]
    tile_b = min(MAX_TILE_B, _round_up(b, 8))
    b_pad = _round_up(b, tile_b)
    nt = b_pad // tile_b
    pad = b_pad - b
    if pad:
        x_flat = jnp.pad(x_flat, ((0, pad), (0, 0)))
        noise_flat = jnp.pad(noise_flat, ((0, pad), (0, 0)))
        meta = jnp.pad(meta, ((0, pad), (0, 0)))   # valid column stays 0 on pad rows

    partials = pl.pallas_call(
        diffusion_loss_kernel,
        out_shape=jax.ShapeDtypeStruct((nt, 8, D), jnp.float32),
        grid=(nt,),
        in_specs=[
            pl.BlockSpec((tile_b, D), lambda i: (i, 0)),        # x
            pl.BlockSpec((tile_b, D), lambda i: (i, 0)),        # noise
            pl.BlockSpec((tile_b, META_W), lambda i: (i, 0)),   # per-row scalars
            pl.BlockSpec((KCAT, HID), lambda i: (0, 0)),        # w_cat (VMEM-resident)
            pl.BlockSpec((1, HID), lambda i: (0, 0)),           # b1
            pl.BlockSpec((HID, D), lambda i: (0, 0)),           # w2 (VMEM-resident)
            pl.BlockSpec((1, D), lambda i: (0, 0)),             # b2
        ],
        out_specs=pl.BlockSpec((1, 8, D), lambda i: (i, 0, 0)),
        compiler_params=pltpu.CompilerParams(
            dimension_semantics=("parallel",),                  # v7x: both TCs engage
            vmem_limit_bytes=32 * 1024 * 1024,
        ),
    )(x_flat, noise_flat, meta,
      params["w_cat"], params["b1"], params["w2"], params["b2"])

    inv_n = 1.0 / float(true_batch * D)        # compile-time constant
    return jnp.sum(partials) * inv_n


# ----------------------------------------------------------------------------
# Wrapper: RNG draws + per-row scalar gathers (glue that must stay in JAX).
# ----------------------------------------------------------------------------
def _prepare_inputs(buffers, x, classes_onehot, key):
    b = x.shape[0]
    k_t, k_noise, k_mask = jax.random.split(key, 3)

    # TODO(synk): torch RNG streams (randint / randn_like / bernoulli) are
    # reproduced with jax.random — same distributions, different draws.
    t = jax.random.randint(k_t, (b,), 0, TIMESTEPS)
    noise = jax.random.normal(k_noise, x.shape, dtype=jnp.float32)
    context_mask = jax.random.bernoulli(k_mask, 1.0 - P_UNCOND, (b,)).astype(jnp.float32)

    # extract(buffer, t, shape) -> per-batch scalars (gathers stay in XLA).
    sac = buffers["sqrt_alphas_cumprod"][t]
    somac = buffers["sqrt_one_minus_alphas_cumprod"][t]

    cid = jnp.argmax(classes_onehot, axis=-1).astype(jnp.float32)
    zeros = jnp.zeros((b,), jnp.float32)
    meta = jnp.stack(
        [sac, somac, t.astype(jnp.float32), cid, context_mask,
         jnp.ones((b,), jnp.float32), zeros, zeros], axis=-1)   # (b, 8)

    return x.reshape(b, D), noise.reshape(b, D), meta


def diffusion_forward(params, buffers, x, classes_onehot, key):
    x_flat, noise_flat, meta = _prepare_inputs(buffers, x, classes_onehot, key)
    return _pallas_loss(x_flat, noise_flat, meta, params, x.shape[0])


# ----------------------------------------------------------------------------
# Pure-JAX reference (same bf16-MXU / f32-VPU precision split as the kernel).
# ----------------------------------------------------------------------------
def reference_loss(params, buffers, x, classes_onehot, key):
    x_flat, noise_flat, meta = _prepare_inputs(buffers, x, classes_onehot, key)
    f32, bf16 = jnp.float32, jnp.bfloat16
    sac, somac = meta[:, 0:1], meta[:, 1:2]
    t_col, cid, cmask = meta[:, 2:3], meta[:, 3:4], meta[:, 4:5]

    x_noisy = sac * x_flat + somac * noise_flat

    lane_c = jnp.arange(CLS_PAD, dtype=f32)[None, :]
    cls = jnp.where(lane_c == cid, cmask, 0.0)

    half = TEMB // 2
    lane_t = jnp.arange(TEMB)[None, :]
    j = jnp.where(lane_t < half, lane_t, lane_t - half).astype(f32)
    freq = jnp.exp((-math.log(10000.0) / half) * j)
    ang = t_col * freq
    temb = jnp.where(lane_t < half, jnp.sin(ang), jnp.cos(ang))

    w_cat = params["w_cat"]
    h = jnp.dot(x_noisy.astype(bf16), w_cat[0:D], preferred_element_type=f32)
    h += jnp.dot(cls.astype(bf16), w_cat[D:D + CLS_PAD], preferred_element_type=f32)
    h += jnp.dot(temb.astype(bf16), w_cat[D + CLS_PAD:KCAT], preferred_element_type=f32)
    h = jnp.maximum(h + params["b1"], 0.0)
    pred = jnp.dot(h.astype(bf16), params["w2"], preferred_element_type=f32) + params["b2"]

    d = noise_flat - pred
    ad = jnp.abs(d)
    per_elem = jnp.where(ad < 1.0, 0.5 * d * d, ad - 0.5)
    return jnp.mean(per_elem)


if __name__ == "__main__":
    key = jax.random.PRNGKey(0)
    k_x, k_cls, k_params, k_fwd = jax.random.split(key, 4)

    x = jax.random.normal(k_x, (B, C, H, W), dtype=jnp.float32)
    class_ids = jax.random.randint(k_cls, (B,), 0, N_CLASSES)
    classes_onehot = jax.nn.one_hot(class_ids, N_CLASSES, dtype=jnp.float32)

    buffers = make_diffusion_buffers(TIMESTEPS)
    params = make_model_params(k_params)

    fwd = jax.jit(diffusion_forward)
    loss = jax.block_until_ready(fwd(params, buffers, x, classes_onehot, k_fwd))
    ref = jax.block_until_ready(reference_loss(params, buffers, x, classes_onehot, k_fwd))

    # Tolerance covers bf16-MXU vs XLA-dot accumulation order and Mosaic vs XLA
    # transcendental (exp/sin/cos) approximations; real bugs are >> 1e-2.
    assert jnp.allclose(loss, ref, rtol=2e-3, atol=2e-3), (loss, ref)

    print("KERNEL_OK")
</pallas_src>

<mosaic_0001>
module attributes {stable_mosaic.version = 11 : i64} {
  func.func @diffusion_loss_kernel(%arg0: i32, %arg1: memref<8x1024xf32, #tpu.memory_space<vmem>>, %arg2: memref<8x1024xf32, #tpu.memory_space<vmem>>, %arg3: memref<8x8xf32, #tpu.memory_space<vmem>>, %arg4: memref<1280x256xbf16, #tpu.memory_space<vmem>>, %arg5: memref<1x256xf32, #tpu.memory_space<vmem>>, %arg6: memref<256x1024xbf16, #tpu.memory_space<vmem>>, %arg7: memref<1x1024xf32, #tpu.memory_space<vmem>>, %arg8: memref<1x8x1024xf32, #tpu.memory_space<vmem>>) attributes {dimension_semantics = [#tpu.dimension_semantics<parallel>], iteration_bounds = array<i64: 1>, scalar_prefetch = 0 : i64, scratch_operands = 0 : i64, tpu.core_type = #tpu.core_type<tc>, window_params = [{transform_indices = @transform_0, window_bounds = array<i64: 8, 1024>}, {transform_indices = @transform_1, window_bounds = array<i64: 8, 1024>}, {transform_indices = @transform_2, window_bounds = array<i64: 8, 8>}, {pipeline_mode = #tpu.pipeline_mode<synchronous>, transform_indices = @transform_3, window_bounds = array<i64: 1280, 256>}, {pipeline_mode = #tpu.pipeline_mode<synchronous>, transform_indices = @transform_4, window_bounds = array<i64: 1, 256>}, {pipeline_mode = #tpu.pipeline_mode<synchronous>, transform_indices = @transform_5, window_bounds = array<i64: 256, 1024>}, {pipeline_mode = #tpu.pipeline_mode<synchronous>, transform_indices = @transform_6, window_bounds = array<i64: 1, 1024>}, {transform_indices = @transform_7, window_bounds = array<i64: 1, 8, 1024>}]} {
    %c0 = arith.constant 0 : index
    %c0_0 = arith.constant 0 : index
    %0 = vector.load %arg3[%c0, %c0_0] : memref<8x8xf32, #tpu.memory_space<vmem>>, vector<8x8xf32>
    %1 = vector.extract_strided_slice %0 {offsets = [0, 0], sizes = [8, 1], strides = [1, 1]} : vector<8x8xf32> to vector<8x1xf32>
    %2 = vector.extract_strided_slice %0 {offsets = [0, 1], sizes = [8, 1], strides = [1, 1]} : vector<8x8xf32> to vector<8x1xf32>
    %3 = vector.extract_strided_slice %0 {offsets = [0, 2], sizes = [8, 1], strides = [1, 1]} : vector<8x8xf32> to vector<8x1xf32>
    %4 = vector.extract_strided_slice %0 {offsets = [0, 3], sizes = [8, 1], strides = [1, 1]} : vector<8x8xf32> to vector<8x1xf32>
    %5 = vector.extract_strided_slice %0 {offsets = [0, 4], sizes = [8, 1], strides = [1, 1]} : vector<8x8xf32> to vector<8x1xf32>
    %6 = vector.extract_strided_slice %0 {offsets = [0, 5], sizes = [8, 1], strides = [1, 1]} : vector<8x8xf32> to vector<8x1xf32>
    %c0_1 = arith.constant 0 : index
    %c0_2 = arith.constant 0 : index
    %7 = vector.load %arg2[%c0_1, %c0_2] : memref<8x1024xf32, #tpu.memory_space<vmem>>, vector<8x1024xf32>
    %c0_3 = arith.constant 0 : index
    %c0_4 = arith.constant 0 : index
    %8 = vector.load %arg1[%c0_3, %c0_4] : memref<8x1024xf32, #tpu.memory_space<vmem>>, vector<8x1024xf32>
    %9 = vector.broadcast %1 : vector<8x1xf32> to vector<8x1024xf32>
    %10 = arith.mulf %9, %8 : vector<8x1024xf32>
    %11 = vector.broadcast %2 : vector<8x1xf32> to vector<8x1024xf32>
    %12 = arith.mulf %11, %7 : vector<8x1024xf32>
    %13 = arith.addf %10, %12 : vector<8x1024xf32>
    %14 = tpu.iota {dimensions = array<i32: 1>} : vector<8x128xi32>
    %15 = arith.sitofp %14 : vector<8x128xi32> to vector<8x128xf32>
    %16 = vector.broadcast %4 : vector<8x1xf32> to vector<8x128xf32>
    %17 = arith.cmpf oeq, %15, %16 : vector<8x128xf32>
    %cst = arith.constant 0.000000e+00 : f32
    %18 = vector.shape_cast %5 : vector<8x1xf32> to vector<8x1xf32>
    %19 = vector.broadcast %18 : vector<8x1xf32> to vector<8x128xf32>
    %20 = vector.broadcast %cst : f32 to vector<8x128xf32>
    %21 = arith.select %17, %19, %20 : vector<8x128xi1>, vector<8x128xf32>
    %22 = tpu.iota {dimensions = array<i32: 1>} : vector<8x128xi32>
    %c64_i32 = arith.constant 64 : i32
    %23 = vector.broadcast %c64_i32 : i32 to vector<8x128xi32>
    %24 = arith.cmpi slt, %22, %23 : vector<8x128xi32>
    %c64_i32_5 = arith.constant 64 : i32
    %25 = vector.broadcast %c64_i32_5 : i32 to vector<8x128xi32>
    %26 = arith.subi %22, %25 : vector<8x128xi32>
    %27 = arith.select %24, %22, %26 : vector<8x128xi1>, vector<8x128xi32>
    %28 = arith.sitofp %27 : vector<8x128xi32> to vector<8x128xf32>
    %cst_6 = arith.constant -0.14391157 : f32
    %29 = vector.broadcast %cst_6 : f32 to vector<8x128xf32>
    %30 = arith.mulf %29, %28 : vector<8x128xf32>
    %31 = math.exp %30 : vector<8x128xf32>
    %32 = vector.broadcast %3 : vector<8x1xf32> to vector<8x128xf32>
    %33 = arith.mulf %32, %31 : vector<8x128xf32>
    %c64_i32_7 = arith.constant 64 : i32
    %34 = vector.broadcast %c64_i32_7 : i32 to vector<8x128xi32>
    %35 = arith.cmpi slt, %22, %34 : vector<8x128xi32>
    %36 = math.sin %33 : vector<8x128xf32>
    %37 = math.cos %33 : vector<8x128xf32>
    %38 = arith.select %35, %36, %37 : vector<8x128xi1>, vector<8x128xf32>
    %39 = arith.truncf %13 : vector<8x1024xf32> to vector<8x1024xbf16>
    %c0_8 = arith.constant 0 : index
    %c0_9 = arith.constant 0 : index
    %40 = vector.load %arg4[%c0_8, %c0_9] : memref<1280x256xbf16, #tpu.memory_space<vmem>>, vector<1024x256xbf16>
    %cst_10 = arith.constant dense<0.000000e+00> : vector<8x256xf32>
    %41 = tpu.matmul %39, %40, %cst_10 {dimension_numbers = #tpu.dot_dimension_numbers<[1], [0], [0], [1], [0, 0, 1, 1], [], []>} : vector<8x1024xbf16>, vector<1024x256xbf16>, vector<8x256xf32> -> vector<8x256xf32>
    %42 = arith.truncf %21 : vector<8x128xf32> to vector<8x128xbf16>
    %c1024 = arith.constant 1024 : index
    %c0_11 = arith.constant 0 : index
    %43 = vector.load %arg4[%c1024, %c0_11] : memref<1280x256xbf16, #tpu.memory_space<vmem>>, vector<128x256xbf16>
    %cst_12 = arith.constant dense<0.000000e+00> : vector<8x256xf32>
    %44 = tpu.matmul %42, %43, %cst_12 {dimension_numbers = #tpu.dot_dimension_numbers<[1], [0], [0], [1], [0, 0, 1, 1], [], []>} : vector<8x128xbf16>, vector<128x256xbf16>, vector<8x256xf32> -> vector<8x256xf32>
    %45 = arith.addf %41, %44 : vector<8x256xf32>
    %46 = arith.truncf %38 : vector<8x128xf32> to vector<8x128xbf16>
    %c1152 = arith.constant 1152 : index
    %c0_13 = arith.constant 0 : index
    %47 = vector.load %arg4[%c1152, %c0_13] : memref<1280x256xbf16, #tpu.memory_space<vmem>>, vector<128x256xbf16>
    %cst_14 = arith.constant dense<0.000000e+00> : vector<8x256xf32>
    %48 = tpu.matmul %46, %47, %cst_14 {dimension_numbers = #tpu.dot_dimension_numbers<[1], [0], [0], [1], [0, 0, 1, 1], [], []>} : vector<8x128xbf16>, vector<128x256xbf16>, vector<8x256xf32> -> vector<8x256xf32>
    %49 = arith.addf %45, %48 : vector<8x256xf32>
    %c0_15 = arith.constant 0 : index
    %c0_16 = arith.constant 0 : index
    %50 = vector.load %arg5[%c0_15, %c0_16] : memref<1x256xf32, #tpu.memory_space<vmem>>, vector<1x256xf32>
    %51 = vector.broadcast %50 : vector<1x256xf32> to vector<8x256xf32>
    %52 = arith.addf %49, %51 : vector<8x256xf32>
    %cst_17 = arith.constant 0.000000e+00 : f32
    %53 = vector.broadcast %cst_17 : f32 to vector<8x256xf32>
    %54 = arith.maximumf %52, %53 : vector<8x256xf32>
    %55 = arith.truncf %54 : vector<8x256xf32> to vector<8x256xbf16>
    %c0_18 = arith.constant 0 : index
    %c0_19 = arith.constant 0 : index
    %56 = vector.load %arg6[%c0_18, %c0_19] : memref<256x1024xbf16, #tpu.memory_space<vmem>>, vector<256x1024xbf16>
    %cst_20 = arith.constant dense<0.000000e+00> : vector<8x1024xf32>
    %57 = tpu.matmul %55, %56, %cst_20 {dimension_numbers = #tpu.dot_dimension_numbers<[1], [0], [0], [1], [0, 0, 1, 1], [], []>} : vector<8x256xbf16>, vector<256x1024xbf16>, vector<8x1024xf32> -> vector<8x1024xf32>
    %c0_21 = arith.constant 0 : index
    %c0_22 = arith.constant 0 : index
    %58 = vector.load %arg7[%c0_21, %c0_22] : memref<1x1024xf32, #tpu.memory_space<vmem>>, vector<1x1024xf32>
    %59 = vector.broadcast %58 : vector<1x1024xf32> to vector<8x1024xf32>
    %60 = arith.addf %57, %59 : vector<8x1024xf32>
    %61 = arith.subf %7, %60 : vector<8x1024xf32>
    %62 = math.absf %61 : vector<8x1024xf32>
    %cst_23 = arith.constant 1.000000e+00 : f32
    %63 = vector.broadcast %cst_23 : f32 to vector<8x1024xf32>
    %64 = arith.cmpf olt, %62, %63 : vector<8x1024xf32>
    %cst_24 = arith.constant 5.000000e-01 : f32
    %65 = vector.broadcast %cst_24 : f32 to vector<8x1024xf32>
    %66 = arith.mulf %65, %61 : vector<8x1024xf32>
    %67 = arith.mulf %66, %61 : vector<8x1024xf32>
    %cst_25 = arith.constant 5.000000e-01 : f32
    %68 = vector.broadcast %cst_25 : f32 to vector<8x1024xf32>
    %69 = arith.subf %62, %68 : vector<8x1024xf32>
    %70 = arith.select %64, %67, %69 : vector<8x1024xi1>, vector<8x1024xf32>
    %71 = vector.broadcast %6 : vector<8x1xf32> to vector<8x1024xf32>
    %72 = arith.mulf %70, %71 : vector<8x1024xf32>
    %c0_26 = arith.constant 0 : index
    %c0_27 = arith.constant 0 : index
    %c0_28 = arith.constant 0 : index
    %73 = vector.load %arg8[%c0_26, %c0_27, %c0_28] : memref<1x8x1024xf32, #tpu.memory_space<vmem>>, vector<1x8x1024xf32>
    %74 = vector.shape_cast %73 : vector<1x8x1024xf32> to vector<8x1024xf32>
    %75 = vector.shape_cast %72 : vector<8x1024xf32> to vector<1x8x1024xf32>
    tpu.vector_store %arg8[%c0_26, %c0_27, %c0_28], %75 {strides = array<i32>} : memref<1x8x1024xf32, #tpu.memory_space<vmem>>, vector<1x8x1024xf32>,
    return
  }
  func.func @transform_0(%arg0: i32) -> (i32, i32) {
    %c0_i32 = arith.constant 0 : i32
    %c0_i32_0 = arith.constant 0 : i32
    return %arg0, %c0_i32 : i32, i32
  }
  func.func @transform_1(%arg0: i32) -> (i32, i32) {
    %c0_i32 = arith.constant 0 : i32
    %c0_i32_0 = arith.constant 0 : i32
    return %arg0, %c0_i32 : i32, i32
  }
  func.func @transform_2(%arg0: i32) -> (i32, i32) {
    %c0_i32 = arith.constant 0 : i32
    %c0_i32_0 = arith.constant 0 : i32
    return %arg0, %c0_i32 : i32, i32
  }
  func.func @transform_3(%arg0: i32) -> (i32, i32) {
    %c0_i32 = arith.constant 0 : i32
    %c0_i32_0 = arith.constant 0 : i32
    %c0_i32_1 = arith.constant 0 : i32
    return %c0_i32, %c0_i32_0 : i32, i32
  }
  func.func @transform_4(%arg0: i32) -> (i32, i32) {
    %c0_i32 = arith.constant 0 : i32
    %c0_i32_0 = arith.constant 0 : i32
    %c0_i32_1 = arith.constant 0 : i32
    return %c0_i32, %c0_i32_0 : i32, i32
  }
  func.func @transform_5(%arg0: i32) -> (i32, i32) {
    %c0_i32 = arith.constant 0 : i32
    %c0_i32_0 = arith.constant 0 : i32
    %c0_i32_1 = arith.constant 0 : i32
    return %c0_i32, %c0_i32_0 : i32, i32
  }
  func.func @transform_6(%arg0: i32) -> (i32, i32) {
    %c0_i32 = arith.constant 0 : i32
    %c0_i32_0 = arith.constant 0 : i32
    %c0_i32_1 = arith.constant 0 : i32
    return %c0_i32, %c0_i32_0 : i32, i32
  }
  func.func @transform_7(%arg0: i32) -> (i32, i32, i32) {
    %c0_i32 = arith.constant 0 : i32
    %c0_i32_0 = arith.constant 0 : i32
    %c0_i32_1 = arith.constant 0 : i32
    return %arg0, %c0_i32, %c0_i32_0 : i32, i32, i32
  }
}

</mosaic_0001>

<bundles_post_ra>
// kernel: diffusion_forward.1
= control target key start
LH: loop header
LB: loop body
LE: loop exit
PB: predicated region body
PF: predicated region fallthrough
CT: control target
= control target key end

     0   :  { %v3185_v0 = vmov 3   ;;  %v3186_v1 = vmov 0   ;;  %v3187_v7 = vmov 1   ;;  %v3188_v8 = vmov 4   ;;  %s4371_s2 = inlined_call_operand.vmem [shape: f32[8,8], index: 2, kind: input, shape index: {}]   ;;  %s4372_s3 = inlined_call_operand.vmem [shape: bf16[1280,256], index: 3, kind: input, shape index: {}]   ;;  %s4373_s0 = inlined_call_operand.vmem [shape: f32[8,1024], index: 0, kind: input, shape index: {}]   ;;  %s4374_s1 = inlined_call_operand.vmem [shape: f32[8,1024], index: 1, kind: input, shape index: {}]   ;;  %s4375_s5 = inlined_call_operand.vmem [shape: bf16[256,1024], index: 5, kind: input, shape index: {}]   ;;  %s4376_s4 = inlined_call_operand.vmem [shape: f32[1,256], index: 4, kind: input, shape index: {}]   ;;  %s4377_s6 = inlined_call_operand.vmem [shape: f32[1,1024], index: 6, kind: input, shape index: {}]   ;;  %s4378_s7 = inlined_call_operand.vmem [shape: f32[1,8,1024], index: 7, kind: output, shape index: {}]  }
   0x1   :  { %2924 = vset.pattern.permute.xlu0 %v3185_v0  ;;  %2926 = vset.pattern.permute.xlu1 %v3186_v1  ;;  %v27_v2 = vld [vmem:[%s4371_s2] sm:$0xff]  ;;  %v2933_v5 = vld [vmem:[%s4372_s3 + $0x14] ss:$8 sps:$4 sm:$0xff]   ;;  %v2935_v6 = vld [vmem:[%s4372_s3 + $0x10] ss:$8 sps:$4 sm:$0xff]   ;;  %v3189_v12 = vmov 2   ;;  %v77_v56 = vlaneseq }
   0x2   :  { %46 = vperm.xlu1 %2926, %v27_v2   ;;  %81 = vperm.xlu0 %2924, %v27_v2   ;;  %v2930_v3 = vld [vmem:[%s4372_s3 + $0x4] ss:$8 sps:$4 sm:$0xff]   ;;  %v2932_v4 = vld [vmem:[%s4372_s3] ss:$8 sps:$4 sm:$0xff]   ;;  %v2939_v11 = vld [vmem:[%s4372_s3 + $0x34] ss:$8 sps:$4 sm:$0xff]  }
   0x3   :  { %575 = vmatprep.mubr.bf16.mxu0 %v3186_v1  ;;  %1224 = vmatprep.subr.bf16.mxu1 %v2930_v3  ;;  %v2936_v9 = vld [vmem:[%s4372_s3 + $0x24] ss:$8 sps:$4 sm:$0xff]   ;;  %v2938_v10 = vld [vmem:[%s4372_s3 + $0x20] ss:$8 sps:$4 sm:$0xff]   ;;  %v2941_v15 = vld [vmem:[%s4372_s3 + $0x30] ss:$8 sps:$4 sm:$0xff]  }
   0x4   :  { %1225 = vmatpush1.bf16.msra.mxu1 %v2932_v4  ;;  %v2951_v13 = vld [vmem:[%s4372_s3 + $0x404] ss:$8 sps:$4 sm:$0xff]   ;;  %v2953_v14 = vld [vmem:[%s4372_s3 + $0x400] ss:$8 sps:$4 sm:$0xff]   ;;  %v2957_v17 = vld [vmem:[%s4372_s3 + $0x414] ss:$8 sps:$4 sm:$0xff]  }
   0x5   :  { %1226 = vmatprep.subr.bf16.mxu1 %v2933_v5  ;;  %v2942_v16 = vld [vmem:[%s4372_s3 + $0x44] ss:$8 sps:$4 sm:$0xff]   ;;  %543 = vmatprep.subr.bf16.mxu0 %v2951_v13  ;;  %v2959_v18 = vld [vmem:[%s4372_s3 + $0x410] ss:$8 sps:$4 sm:$0xff]   ;;  %v2944_v20 = vld [vmem:[%s4372_s3 + $0x40] ss:$8 sps:$4 sm:$0xff]  }
   0x6   :  { %2927 = vset.pattern.permute.xlu1 %v3187_v7  ;;  %2925 = vset.pattern.permute.xlu0 %v3188_v8  ;;  %v2963_v19 = vld [vmem:[%s4372_s3 + $0x424] ss:$8 sps:$4 sm:$0xff]   ;;  %v2945_v21 = vld [vmem:[%s4372_s3 + $0x54] ss:$8 sps:$4 sm:$0xff]   ;;  %v2965_v22 = vld [vmem:[%s4372_s3 + $0x420] ss:$8 sps:$4 sm:$0xff]  }
   0x7   :  { %58 = vperm.xlu1 %2927, %v27_v2   ;;  %86 = vperm.xlu0 %2925, %v27_v2   ;;  %v2969_v23 = vld [vmem:[%s4372_s3 + $0x434] ss:$8 sps:$4 sm:$0xff]   ;;  %v2947_v24 = vld [vmem:[%s4372_s3 + $0x50] ss:$8 sps:$4 sm:$0xff]   ;;  %v2948_v25 = vld [vmem:[%s4372_s3 + $0x64] ss:$8 sps:$4 sm:$0xff]  }
   0x8   :  { %1227 = vmatpush1.bf16.msra.mxu1 %v2935_v6  ;;  %544 = vmatpush1.bf16.msra.mxu0 %v2953_v14  ;;  %v2971_v26 = vld [vmem:[%s4372_s3 + $0x430] ss:$8 sps:$4 sm:$0xff]   ;;  %v2975_v27 = vld [vmem:[%s4372_s3 + $0x444] ss:$8 sps:$4 sm:$0xff]   ;;  %v2950_v28 = vld [vmem:[%s4372_s3 + $0x60] ss:$8 sps:$4 sm:$0xff]  }
   0x9   :  { %1228 = vmatprep.subr.bf16.mxu1 %v2936_v9  ;;  %545 = vmatprep.subr.bf16.mxu0 %v2957_v17  ;;  %v2954_v29 = vld [vmem:[%s4372_s3 + $0x74] ss:$8 sps:$4 sm:$0xff]   ;;  %v2977_v30 = vld [vmem:[%s4372_s3 + $0x440] ss:$8 sps:$4 sm:$0xff]   ;;  %v2956_v32 = vld [vmem:[%s4372_s3 + $0x70] ss:$8 sps:$4 sm:$0xff]  }
   0xa   :  { %v2981_v31 = vld [vmem:[%s4372_s3 + $0x454] ss:$8 sps:$4 sm:$0xff]   ;;  %v2960_v33 = vld [vmem:[%s4372_s3 + $0x84] ss:$8 sps:$4 sm:$0xff]   ;;  %v2983_v34 = vld [vmem:[%s4372_s3 + $0x450] ss:$8 sps:$4 sm:$0xff]  }
   0xb   :  { %2928 = vset.pattern.permute.xlu1 %v3189_v12  ;;  %v2987_v35 = vld [vmem:[%s4372_s3 + $0x464] ss:$8 sps:$4 sm:$0xff]   ;;  %v2962_v36 = vld [vmem:[%s4372_s3 + $0x80] ss:$8 sps:$4 sm:$0xff]   ;;  %v2966_v37 = vld [vmem:[%s4372_s3 + $0x94] ss:$8 sps:$4 sm:$0xff]  }
   0xc   :  { %98 = vperm.xlu1 %2928, %v27_v2   ;;  %1229 = vmatpush1.bf16.msra.mxu1 %v2938_v10  ;;  %v2989_v38 = vld [vmem:[%s4372_s3 + $0x460] ss:$8 sps:$4 sm:$0xff]   ;;  %v2993_v39 = vld [vmem:[%s4372_s3 + $0x474] ss:$8 sps:$4 sm:$0xff]   ;;  %v2968_v40 = vld [vmem:[%s4372_s3 + $0x90] ss:$8 sps:$4 sm:$0xff]  }
   0xd   :  { %1230 = vmatprep.subr.bf16.mxu1 %v2939_v11  ;;  %546 = vmatpush1.bf16.msra.mxu0 %v2959_v18  ;;  %v2972_v41 = vld [vmem:[%s4372_s3 + $0xa4] ss:$8 sps:$4 sm:$0xff]   ;;  %v2995_v42 = vld [vmem:[%s4372_s3 + $0x470] ss:$8 sps:$4 sm:$0xff]   ;;  %v2974_v44 = vld [vmem:[%s4372_s3 + $0xa0] ss:$8 sps:$4 sm:$0xff]  }
   0xe   :  { %547 = vmatprep.subr.bf16.mxu0 %v2963_v19  ;;  %v3001_v43 = vld [vmem:[%s4372_s3 + $0x104] ss:$8 sps:$4 sm:$0xff]   ;;  %v2978_v45 = vld [vmem:[%s4372_s3 + $0xb4] ss:$8 sps:$4 sm:$0xff]   ;;  %v2980_v46 = vld [vmem:[%s4372_s3 + $0xb0] ss:$8 sps:$4 sm:$0xff]  }
   0xf   :  { %v2984_v47 = vld [vmem:[%s4372_s3 + $0xc4] ss:$8 sps:$4 sm:$0xff]   ;;  %v2986_v48 = vld [vmem:[%s4372_s3 + $0xc0] ss:$8 sps:$4 sm:$0xff]   ;;  %v2990_v49 = vld [vmem:[%s4372_s3 + $0xd4] ss:$8 sps:$4 sm:$0xff]  }
  0x10   :  { %1231 = vmatpush1.bf16.msra.mxu1 %v2941_v15  ;;  %v2992_v50 = vld [vmem:[%s4372_s3 + $0xd0] ss:$8 sps:$4 sm:$0xff]   ;;  %v2996_v51 = vld [vmem:[%s4372_s3 + $0xe4] ss:$8 sps:$4 sm:$0xff]   ;;  %v2998_v52 = vld [vmem:[%s4372_s3 + $0xe0] ss:$8 sps:$4 sm:$0xff]  }
  0x11   :  { %1232 = vmatprep.subr.bf16.mxu1 %v2942_v16  ;;  %548 = vmatpush1.bf16.msra.mxu0 %v2965_v22  ;;  %v3002_v53 = vld [vmem:[%s4372_s3 + $0xf4] ss:$8 sps:$4 sm:$0xff]   ;;  %v3004_v54 = vld [vmem:[%s4372_s3 + $0xf0] ss:$8 sps:$4 sm:$0xff]   ;;  %v3010_v55 = vld [vmem:[%s4372_s3 + $0x204] ss:$8 sps:$4 sm:$0xff]  }
  0x12   :  { %549 = vmatprep.subr.bf16.mxu0 %v2969_v23  ;;  %v3393_v57 = vand.u32 127, %v77_v56  ;;  %v37_v3 = vld [vmem:[%s4373_s0 + $0x8] sm:$0xff]  ;;  %v36_v4 = vld [vmem:[%s4373_s0] sm:$0xff]  ;;  %v39_v5 = vld [vmem:[%s4373_s0 + $0x18] sm:$0xff] }
  0x13   :  { %v41_v6 = vld [vmem:[%s4373_s0 + $0x28] sm:$0xff]  ;;  %v40_v7 = vld [vmem:[%s4373_s0 + $0x20] sm:$0xff]  ;;  %v42_v8 = vld [vmem:[%s4373_s0 + $0x30] sm:$0xff] }
  0x14   :  { %1233 = vmatpush1.bf16.msra.mxu1 %v2944_v20  ;;  %v2600_v58 = vadd.s32 4294967232, %v3393_v57  ;;  %vm90_vm0 = vcmp.lt.s32.totalorder %v3393_v57, 64  ;;  %v79_v63 = vcvt.s32.f32 %v3393_v57  ;;  %v29_v9 = vld [vmem:[%s4374_s1 + $0x8] sm:$0xff]  ;;  %v28_v10 = vld [vmem:[%s4374_s1] sm:$0xff]  ;;  %v31_v11 = vld [vmem:[%s4374_s1 + $0x18] sm:$0xff] }
  0x15   :  { %1234 = vmatprep.subr.bf16.mxu1 %v2945_v21  ;;  %550 = vmatpush1.bf16.msra.mxu0 %v2971_v26  ;;  %v33_v16 = vld [vmem:[%s4374_s1 + $0x28] sm:$0xff]  ;;  %v32_v17 = vld [vmem:[%s4374_s1 + $0x20] sm:$0xff]  ;;  %v34_v23 = vld [vmem:[%s4374_s1 + $0x30] sm:$0xff] }
  0x16   :  { %551 = vmatprep.subr.bf16.mxu0 %v2975_v27  ;;  %v92_v59 = vsel %vm90_vm0, %v3393_v57, %v2600_v58  ;;  %v2999_v20 = vld [vmem:[%s4372_s3 + $0x100] ss:$8 sps:$4 sm:$0xff]   ;;  %v3007_v26 = vld [vmem:[%s4372_s3 + $0x114] ss:$8 sps:$4 sm:$0xff]  }
  0x17   :  { %v93_v60 = vcvt.s32.f32 %v92_v59  ;;  %v3157_v57 = vld [vmem:[%s4372_s3 + $0x3b4] ss:$8 sps:$4 sm:$0xff]  }
  0x18   :  { %1235 = vmatpush1.bf16.msra.mxu1 %v2947_v24 }
  0x19   :  { %1236 = vmatprep.subr.bf16.mxu1 %v2948_v25  ;;  %552 = vmatpush1.bf16.msra.mxu0 %v2977_v30  ;;  %v94_v61 = vmul.f32 -0.14391157, %v93_v60  ;;  %v3017_v60 = vld [vmem:[%s4372_s3 + $0x130] ss:$8 sps:$4 sm:$0xff]  }
  0x1a   :  { %553 = vmatprep.subr.bf16.mxu0 %v2981_v31 }
  0x1b   :  { %v95_v62 = vmul.f32 1.442695, %v94_v61  ;;  %v3020_v61 = vld [vmem:[%s4372_s3 + $0x220] ss:$8 sps:$4 sm:$0xff]  }
  0x1c   :  { %1237 = vmatpush1.bf16.msra.mxu1 %v2950_v28 }
  0x1d   :  { %1238 = vmatprep.subr.bf16.mxu1 %v2954_v29  ;;  %554 = vmatpush1.bf16.msra.mxu0 %v2983_v34  ;;  %3170 = vpow2.f32 %v95_v62  ;;  %v3025_v62 = vld [vmem:[%s4372_s3 + $0x144] ss:$8 sps:$4 sm:$0xff]  }
  0x1e   :  { %555 = vmatprep.subr.bf16.mxu0 %v2987_v35 }
  0x20   :  { %1239 = vmatpush1.bf16.msra.mxu1 %v2956_v32 }
  0x21   :  { %1240 = vmatprep.subr.bf16.mxu1 %v2960_v33  ;;  %556 = vmatpush1.bf16.msra.mxu0 %v2989_v38 }
  0x22   :  { %557 = vmatprep.subr.bf16.mxu0 %v2993_v39 }
  0x24   :  { %1241 = vmatpush1.bf16.msra.mxu1 %v2962_v36 }
  0x25   :  { %1242 = vmatprep.subr.bf16.mxu1 %v2966_v37  ;;  %558 = vmatpush1.bf16.msra.mxu0 %v2995_v42  ;;  %v3005_v37 = vld [vmem:[%s4372_s3 + $0x110] ss:$8 sps:$4 sm:$0xff]   ;;  %v3008_v42 = vld [vmem:[%s4372_s3 + $0x200] ss:$8 sps:$4 sm:$0xff]  }
  0x26   :  { %1265 = vmatprep.subr.bf16.mxu0 %v3001_v43 }
  0x27   :  { %v3171_v32 = vpop.eup %3170 }
  0x28   :  { %1243 = vmatpush1.bf16.msra.mxu1 %v2968_v40 }
  0x29   :  { %1244 = vmatprep.subr.bf16.mxu1 %v2972_v41 }
  0x2c   :  { %1245 = vmatpush1.bf16.msra.mxu1 %v2974_v44  ;;  %v3013_v44 = vld [vmem:[%s4372_s3 + $0x124] ss:$8 sps:$4 sm:$0xff]  }
  0x2d   :  { %1246 = vmatprep.subr.bf16.mxu1 %v2978_v45 }
  0x30   :  { %1247 = vmatpush1.bf16.msra.mxu1 %v2980_v46 }
  0x31   :  { %1248 = vmatprep.subr.bf16.mxu1 %v2984_v47 }
  0x34   :  { %1249 = vmatpush1.bf16.msra.mxu1 %v2986_v48  ;;  %v3016_v48 = vld [vmem:[%s4372_s3 + $0x214] ss:$8 sps:$4 sm:$0xff]  }
  0x35   :  { %1250 = vmatprep.subr.bf16.mxu1 %v2990_v49 }
  0x38   :  { %1251 = vmatpush1.bf16.msra.mxu1 %v2992_v50 }
  0x39   :  { %1252 = vmatprep.subr.bf16.mxu1 %v2996_v51  ;;  %v3011_v51 = vld [vmem:[%s4372_s3 + $0x120] ss:$8 sps:$4 sm:$0xff]  }
  0x3c   :  { %1253 = vmatpush1.bf16.msra.mxu1 %v2998_v52  ;;  %v3014_v52 = vld [vmem:[%s4372_s3 + $0x210] ss:$8 sps:$4 sm:$0xff]  }
  0x3d   :  { %1254 = vmatprep.subr.bf16.mxu1 %v3002_v53  ;;  %v3019_v53 = vld [vmem:[%s4372_s3 + $0x134] ss:$8 sps:$4 sm:$0xff]  }
  0x40   :  { %1255 = vmatpush1.bf16.msra.mxu1 %v3004_v54 }
  0x41   :  { %1306 = vmatprep.subr.bf16.mxu1 %v3010_v55  ;;  %v3022_v55 = vld [vmem:[%s4372_s3 + $0x224] ss:$8 sps:$4 sm:$0xff]  }
  0x81   :  { %v82_v0 = vpop.permute.xlu0 %81  ;;  %v3401_v2 = vpop.permute.xlu1 %46 }
  0x82   :  { %vm3430_vm1 = vcmp.eq.f32.partialorder %v79_v63, %v82_v0  ;;  %v50_v13 = vmul.f32 %v3401_v2, %v37_v3  ;;  %v49_v14 = vmul.f32 %v3401_v2, %v36_v4  ;;  %v52_v15 = vmul.f32 %v3401_v2, %v39_v5  ;;  %v3028_v0 = vld [vmem:[%s4372_s3 + $0x234] ss:$8 sps:$4 sm:$0xff]   ;;  %v3023_v4 = vld [vmem:[%s4372_s3 + $0x140] ss:$8 sps:$4 sm:$0xff]  }
  0x83   :  { %v54_v21 = vmul.f32 %v3401_v2, %v41_v6  ;;  %v53_v22 = vmul.f32 %v3401_v2, %v40_v7  ;;  %v55_v24 = vmul.f32 %v3401_v2, %v42_v8  ;;  %vm2625_vm2 = vmpackc.low %vm3430_vm1, %vm3430_vm1  ;;  %v3026_v6 = vld [vmem:[%s4372_s3 + $0x230] ss:$8 sps:$4 sm:$0xff]   ;;  %v3031_v7 = vld [vmem:[%s4372_s3 + $0x154] ss:$8 sps:$4 sm:$0xff]  }
  0x86   :  { %v3443_v18 = vpop.permute.xlu1 %58  ;;  %v87_v19 = vpop.permute.xlu0 %86 }
  0x87   :  { %v2626_v25 = vpack.c.bf16 %v87_v19, %v87_v19  ;;  %v62_v27 = vmul.f32 %v3443_v18, %v29_v9  ;;  %v61_v28 = vmul.f32 %v3443_v18, %v28_v10  ;;  %v64_v29 = vmul.f32 %v3443_v18, %v31_v11  ;;  %v3034_v9 = vld [vmem:[%s4372_s3 + $0x244] ss:$8 sps:$4 sm:$0xff]  }
  0x88   :  { %v66_v30 = vmul.f32 %v3443_v18, %v33_v16  ;;  %v65_v31 = vmul.f32 %v3443_v18, %v32_v17  ;;  %v67_v36 = vmul.f32 %v3443_v18, %v34_v23  ;;  %v3192_v17 = vmov 2131351028  }
  0x89   :  { %2627 = vmatmul.mubr.msk.bf16.vlgmr.msra.gmra.mrb[0].mxu0 %vm2625_vm2, %v2626_v25  ;;  %v70_v33 = vadd.f32 %v62_v27, %v50_v13  ;;  %v69_v34 = vadd.f32 %v61_v28, %v49_v14  ;;  %v72_v35 = vadd.f32 %v64_v29, %v52_v15  ;;  %v3190_v13 = vmov 683565275   ;;  %v3032_v25 = vld [vmem:[%s4372_s3 + $0x240] ss:$8 sps:$4 sm:$0xff]  }
  0x8a   :  { %1266 = vmatpush1.bf16.msra.mxu0 %v2999_v20  ;;  %v74_v38 = vadd.f32 %v66_v30, %v54_v21  ;;  %v3469_v39 = vadd.f32 %v65_v31, %v53_v22  ;;  %v3477_v46 = vadd.f32 %v67_v36, %v55_v24  ;;  %v3191_v15 = vmov 2475754826   ;;  %v3029_v20 = vld [vmem:[%s4372_s3 + $0x150] ss:$8 sps:$4 sm:$0xff]   ;;  %v3040_v31 = vld [vmem:[%s4372_s3 + $0x254] ss:$8 sps:$4 sm:$0xff]  }
  0x8b   :  { %v99_v40 = vpop.permute.xlu1 %98  ;;  %1267 = vmatprep.subr.bf16.mxu0 %v3007_v26  ;;  %v311_v41 = vpack.c.bf16 %v70_v33, %v70_v33  ;;  %v310_v43 = vpack.c.bf16 %v69_v34, %v69_v34  ;;  %v313_v45 = vpack.c.bf16 %v72_v35, %v72_v35  ;;  %v3193_v21 = vmov 2102212464   ;;  %v3037_v26 = vld [vmem:[%s4372_s3 + $0x164] ss:$8 sps:$4 sm:$0xff]  }
  0x8c   :  { %v3479_v47 = vmul.f32 %v3171_v32, %v99_v40  ;;  %v315_v49 = vpack.c.bf16 %v74_v38, %v74_v38  ;;  %v3194_v23 = vmov 920167782   ;;  %v3195_v33 = vmov 1326507024   ;;  %v3035_v40 = vld [vmem:[%s4372_s3 + $0x160] ss:$8 sps:$4 sm:$0xff]  }
  0x8d   :  { %1256 = vmatprep.mubr.bf16.mxu1 %v311_v41  ;;  %1297 = vmatprep.mubr.bf16.mxu0 %v313_v45 }
  0x8e   :  { %v105_v50 = vand.u32 2139095040, %v3479_v47  ;;  %1268 = vmatpush1.bf16.msra.mxu0 %v3005_v37  ;;  %1257 = vmatmul.mubr.bf16.vlgmr.msra.gmra.mrb[0].mxu1 %v310_v43  ;;  %v102_v58 = vand.u32 2147483647, %v3479_v47  ;;  %v3038_v43 = vld [vmem:[%s4372_s3 + $0x250] ss:$8 sps:$4 sm:$0xff]   ;;  %vm104_vm10 = vcmp.lt.s32.totalorder %v3479_v47, 0 }
  0x8f   :  { %1307 = vmatpush1.bf16.msra.mxu1 %v3008_v42  ;;  %1269 = vmatprep.subr.bf16.mxu0 %v3013_v44  ;;  %v3043_v44 = vld [vmem:[%s4372_s3 + $0x174] ss:$8 sps:$4 sm:$0xff]  }
  0x90   :  { %v106_v54 = vshrl.u32 %v105_v50, 23  ;;  %1308 = vmatprep.subr.bf16.mxu1 %v3016_v48  ;;  %1338 = vmatprep.mubr.bf16.mxu1 %v315_v49  ;;  %v109_v3 = vand.u32 8388607, %v102_v58  ;;  %vm3726_vm11 = vcmp.le.f32.partialorder %v102_v58, 0.7853982 }
  0x91   :  { %v3110_v58 = vld [vmem:[%s4372_s3 + $0x490] ss:$8 sps:$4 sm:$0xff]  }
  0x92   :  { %v2601_v59 = vadd.s32 4294967169, %v106_v54  ;;  %1270 = vmatpush1.bf16.msra.mxu0 %v3011_v51  ;;  %v110_v10 = vor.u32 8388608, %v109_v3  ;;  %v3046_v51 = vld [vmem:[%s4372_s3 + $0x264] ss:$8 sps:$4 sm:$0xff]  }
  0x93   :  { %1309 = vmatpush1.bf16.msra.mxu1 %v3014_v52  ;;  %1271 = vmatprep.subr.bf16.mxu0 %v3019_v53  ;;  %v3049_v3 = vld [vmem:[%s4372_s3 + $0x184] ss:$8 sps:$4 sm:$0xff]  }
  0x94   :  { %v112_v63 = vadd.s32 1, %v2601_v59  ;;  %1310 = vmatprep.subr.bf16.mxu1 %v3022_v55  ;;  %v150_v35 = vshll.u32 %v110_v10, 8 }
  0x96   :  { %vm113_vm3 = vcmp.gt.s32.totalorder %v112_v63, 0  ;;  %1272 = vmatpush1.bf16.msra.mxu0 %v3017_v60  ;;  %v3041_v60 = vld [vmem:[%s4372_s3 + $0x170] ss:$8 sps:$4 sm:$0xff]  }
  0x97   :  { %v114_v5 = vsel %vm113_vm3, %v112_v63, 0  ;;  %1311 = vmatpush1.bf16.msra.mxu1 %v3020_v61  ;;  %1273 = vmatprep.subr.bf16.mxu0 %v3025_v62  ;;  %vm194_vm3 = vweird.f32 %v3479_v47 }
  0x98   :  { %v116_v8 = vand.u32 31, %v114_v5  ;;  %1312 = vmatprep.subr.bf16.mxu1 %v3028_v0  ;;  %v115_v11 = vshrl.u32 %v114_v5, 5  ;;  %v3044_v0 = vld [vmem:[%s4372_s3 + $0x260] ss:$8 sps:$4 sm:$0xff]  }
  0x9a   :  { %v117_v12 = vsub.s32 32, %v116_v8  ;;  %v119_v14 = vshll.u32 %v3190_v13, %v116_v8  ;;  %v122_v16 = vshll.u32 %v3191_v15, %v116_v8  ;;  %v125_v19 = vshll.u32 %v3192_v17, %v116_v8  ;;  %1274 = vmatpush1.bf16.msra.mxu0 %v3023_v4 }
  0x9b   :  { %v128_v22 = vshll.u32 %v3193_v21, %v116_v8  ;;  %v131_v24 = vshll.u32 %v3194_v23, %v116_v8  ;;  %1313 = vmatpush1.bf16.msra.mxu1 %v3026_v6  ;;  %1275 = vmatprep.subr.bf16.mxu0 %v3031_v7  ;;  %vm134_vm4 = vcmp.lt.s32.totalorder %v115_v11, 1  ;;  %vm137_vm5 = vcmp.lt.s32.totalorder %v115_v11, 4  ;;  %v3052_v8 = vld [vmem:[%s4372_s3 + $0x274] ss:$8 sps:$4 sm:$0xff]  }
  0x9c   :  { %v118_v27 = vshrl.u32 %v3190_v13, %v117_v12  ;;  %v120_v28 = vshrl.u32 %v3191_v15, %v117_v12  ;;  %v123_v29 = vshrl.u32 %v3192_v17, %v117_v12  ;;  %v126_v30 = vshrl.u32 %v3193_v21, %v117_v12  ;;  %1314 = vmatprep.subr.bf16.mxu1 %v3034_v9  ;;  %v3047_v9 = vld [vmem:[%s4372_s3 + $0x180] ss:$8 sps:$4 sm:$0xff]   ;;  %v3064_v21 = vld [vmem:[%s4372_s3 + $0x294] ss:$8 sps:$4 sm:$0xff]  }
  0x9d   :  { %v129_v32 = vshrl.u32 %v3194_v23, %v117_v12  ;;  %v132_v34 = vshrl.u32 %v3195_v33, %v117_v12  ;;  %vm135_vm6 = vcmp.lt.s32.totalorder %v115_v11, 2  ;;  %vm136_vm7 = vcmp.lt.s32.totalorder %v115_v11, 3  ;;  %v3050_v11 = vld [vmem:[%s4372_s3 + $0x270] ss:$8 sps:$4 sm:$0xff]   ;;  %v3055_v12 = vld [vmem:[%s4372_s3 + $0x194] ss:$8 sps:$4 sm:$0xff]  }
  0x9e   :  { %v121_v36 = vor.u32 %v120_v28, %v119_v14  ;;  %v124_v37 = vor.u32 %v123_v29, %v122_v16  ;;  %v127_v38 = vor.u32 %v126_v30, %v125_v19  ;;  %1276 = vmatpush1.bf16.msra.mxu0 %v3029_v20  ;;  %v3058_v14 = vld [vmem:[%s4372_s3 + $0x284] ss:$8 sps:$4 sm:$0xff]   ;;  %v3053_v16 = vld [vmem:[%s4372_s3 + $0x190] ss:$8 sps:$4 sm:$0xff]   ;;  %v3056_v19 = vld [vmem:[%s4372_s3 + $0x280] ss:$8 sps:$4 sm:$0xff]  }
  0x9f   :  { %v130_v41 = vor.u32 %v129_v32, %v128_v22  ;;  %v133_v42 = vor.u32 %v132_v34, %v131_v24  ;;  %1315 = vmatpush1.bf16.msra.mxu1 %v3032_v25  ;;  %1277 = vmatprep.subr.bf16.mxu0 %v3037_v26  ;;  %v3061_v20 = vld [vmem:[%s4372_s3 + $0x1a4] ss:$8 sps:$4 sm:$0xff]   ;;  %v3059_v23 = vld [vmem:[%s4372_s3 + $0x1a0] ss:$8 sps:$4 sm:$0xff]   ;;  %v3062_v25 = vld [vmem:[%s4372_s3 + $0x290] ss:$8 sps:$4 sm:$0xff]  }
  0xa0   :  { %v138_v45 = vsel %vm134_vm4, %v118_v27, %v121_v36  ;;  %v139_v48 = vsel %vm137_vm5, %v127_v38, 2102212464  ;;  %v142_v49 = vsel %vm134_vm4, %v121_v36, %v124_v37  ;;  %v146_v50 = vsel %vm134_vm4, %v124_v37, %v127_v38  ;;  %1316 = vmatprep.subr.bf16.mxu1 %v3040_v31  ;;  %v3067_v26 = vld [vmem:[%s4372_s3 + $0x1b4] ss:$8 sps:$4 sm:$0xff]   ;;  %v3070_v27 = vld [vmem:[%s4372_s3 + $0x2a4] ss:$8 sps:$4 sm:$0xff]  }
  0xa1   :  { %v140_v52 = vsel %vm136_vm7, %v124_v37, %v139_v48  ;;  %v143_v53 = vsel %vm137_vm5, %v130_v41, 920167782  ;;  %v147_v54 = vsel %vm137_vm5, %v133_v42, 1326507024  ;;  %v3065_v29 = vld [vmem:[%s4372_s3 + $0x1b0] ss:$8 sps:$4 sm:$0xff]  }
  0xa2   :  { %v144_v55 = vsel %vm136_vm7, %v127_v38, %v143_v53  ;;  %v148_v59 = vsel %vm136_vm7, %v130_v41, %v147_v54  ;;  %1278 = vmatpush1.bf16.msra.mxu0 %v3035_v40  ;;  %v141_v61 = vsel %vm135_vm6, %v138_v45, %v140_v52  ;;  %v3068_v31 = vld [vmem:[%s4372_s3 + $0x2a0] ss:$8 sps:$4 sm:$0xff]   ;;  %v3073_v32 = vld [vmem:[%s4372_s3 + $0x1c4] ss:$8 sps:$4 sm:$0xff]   ;;  %v3076_v33 = vld [vmem:[%s4372_s3 + $0x2b4] ss:$8 sps:$4 sm:$0xff]  }
  0xa3   :  { %v145_v62 = vsel %vm135_vm6, %v142_v49, %v144_v55  ;;  %v149_v63 = vsel %vm135_vm6, %v146_v50, %v148_v59  ;;  %1317 = vmatpush1.bf16.msra.mxu1 %v3038_v43  ;;  %1279 = vmatprep.subr.bf16.mxu0 %v3043_v44  ;;  %v157_v10 = vmul.u32 %v150_v35, %v141_v61  ;;  %v3074_v37 = vld [vmem:[%s4372_s3 + $0x2b0] ss:$8 sps:$4 sm:$0xff]   ;;  %v3079_v38 = vld [vmem:[%s4372_s3 + $0x1d4] ss:$8 sps:$4 sm:$0xff]   ;;  %v3082_v40 = vld [vmem:[%s4372_s3 + $0x2c4] ss:$8 sps:$4 sm:$0xff]  }
  0xa4   :  { %v3566_v4 = vmul.u32.u64.low %v150_v35, %v149_v63  ;;  %v3567_v5 = vmul.u32.u64.high %v150_v35, %v149_v63, %v3566_v4  ;;  %v3569_v6 = vmul.u32.u64.low %v150_v35, %v145_v62  ;;  %v3570_v7 = vmul.u32.u64.high %v150_v35, %v145_v62, %v3569_v6  ;;  %1318 = vmatprep.subr.bf16.mxu1 %v3046_v51  ;;  %v3071_v35 = vld [vmem:[%s4372_s3 + $0x1c0] ss:$8 sps:$4 sm:$0xff]   ;;  %v3077_v42 = vld [vmem:[%s4372_s3 + $0x1d0] ss:$8 sps:$4 sm:$0xff]   ;;  %v3085_v45 = vld [vmem:[%s4372_s3 + $0x1e4] ss:$8 sps:$4 sm:$0xff]  }
  0xa5   :  { %v3080_v44 = vld [vmem:[%s4372_s3 + $0x2c0] ss:$8 sps:$4 sm:$0xff]   ;;  %v38_v48 = vld [vmem:[%s4373_s0 + $0x10] sm:$0xff]  ;;  %v35_v52 = vld [vmem:[%s4374_s1 + $0x38] sm:$0xff] }
  0xa6   :  { %1280 = vmatpush1.bf16.msra.mxu0 %v3041_v60  ;;  %vm159_vm8 = vc.u32 %v3567_v5, %v3569_v6  ;;  %v160_v13 = vadd.s32 1, %v3570_v7  ;;  %v3088_v49 = vld [vmem:[%s4372_s3 + $0x2d4] ss:$8 sps:$4 sm:$0xff]   ;;  %v158_v51 = vadd.s32 %v3569_v6, %v3567_v5  ;;  %v3083_v55 = vld [vmem:[%s4372_s3 + $0x1e0] ss:$8 sps:$4 sm:$0xff]   ;;  %v51_v59 = vmul.f32 %v3401_v2, %v38_v48 }
  0xa7   :  { %1319 = vmatpush1.bf16.msra.mxu1 %v3044_v0  ;;  %1281 = vmatprep.subr.bf16.mxu0 %v3049_v3  ;;  %v30_v50 = vld [vmem:[%s4374_s1 + $0x10] sm:$0xff]  ;;  %v43_v53 = vld [vmem:[%s4373_s0 + $0x38] sm:$0xff]  ;;  %v3094_v4 = vld [vmem:[%s4372_s3 + $0x2e4] ss:$8 sps:$4 sm:$0xff]   ;;  %v68_v6 = vmul.f32 %v3443_v18, %v35_v52 }
  0xa8   :  { %1320 = vmatprep.subr.bf16.mxu1 %v3052_v8  ;;  %v161_v15 = vsel %vm159_vm8, %v160_v13, %v3570_v7  ;;  %v3086_v63 = vld [vmem:[%s4372_s3 + $0x2d0] ss:$8 sps:$4 sm:$0xff]   ;;  %v3091_v0 = vld [vmem:[%s4372_s3 + $0x1f4] ss:$8 sps:$4 sm:$0xff]   ;;  %v63_v3 = vmul.f32 %v3443_v18, %v30_v50  ;;  %v56_v5 = vmul.f32 %v3401_v2, %v43_v53  ;;  %v3097_v2 = vld [vmem:[%s4372_s3 + $0x304] ss:$8 sps:$4 sm:$0xff]  }
  0xa9   :  { %v162_v17 = vadd.s32 %v161_v15, %v157_v10  ;;  %v3100_v18 = vld [vmem:[%s4372_s3 + $0x2f4] ss:$8 sps:$4 sm:$0xff]   ;;  %v3122_v48 = vld [vmem:[%s4372_s3 + $0x4b0] ss:$8 sps:$4 sm:$0xff]   ;;  %v3130_v50 = vld [vmem:[%s4372_s3 + $0x4c4] ss:$8 sps:$4 sm:$0xff]  }
  0xaa   :  { %1282 = vmatpush1.bf16.msra.mxu0 %v3047_v9  ;;  %v3089_v9 = vld [vmem:[%s4372_s3 + $0x1f0] ss:$8 sps:$4 sm:$0xff]   ;;  %v71_v13 = vadd.f32 %v63_v3, %v51_v59  ;;  %v3128_v59 = vld [vmem:[%s4372_s3 + $0x4c0] ss:$8 sps:$4 sm:$0xff]  }
  0xab   :  { %1321 = vmatpush1.bf16.msra.mxu1 %v3050_v11  ;;  %1283 = vmatprep.subr.bf16.mxu0 %v3055_v12  ;;  %v163_v22 = vadd.s32 536870912, %v162_v17  ;;  %v3092_v12 = vld [vmem:[%s4372_s3 + $0x2e0] ss:$8 sps:$4 sm:$0xff]   ;;  %v3125_v53 = vld [vmem:[%s4372_s3 + $0x350] ss:$8 sps:$4 sm:$0xff]  }
  0xac   :  { %1322 = vmatprep.subr.bf16.mxu1 %v3058_v14  ;;  %v76_v14 = vadd.f32 %v68_v6, %v56_v5  ;;  %v3134_v3 = vld [vmem:[%s4372_s3 + $0x4d0] ss:$8 sps:$4 sm:$0xff]   ;;  %v3142_v5 = vld [vmem:[%s4372_s3 + $0x4e4] ss:$8 sps:$4 sm:$0xff]  }
  0xad   :  { %v3607_v24 = vshrl.u32 %v163_v22, 30  ;;  %v3103_v22 = vld [vmem:[%s4372_s3 + $0x314] ss:$8 sps:$4 sm:$0xff]  }
  0xae   :  { %1284 = vmatpush1.bf16.msra.mxu0 %v3053_v16 }
  0xaf   :  { %1323 = vmatpush1.bf16.msra.mxu1 %v3056_v19  ;;  %1285 = vmatprep.subr.bf16.mxu0 %v3061_v20  ;;  %v165_v28 = vshll.u32 %v3607_v24, 30  ;;  %v312_v20 = vpack.c.bf16 %v71_v13, %v71_v13 }
  0xb0   :  { %1324 = vmatprep.subr.bf16.mxu1 %v3064_v21  ;;  %v3098_v21 = vld [vmem:[%s4372_s3 + $0x2f0] ss:$8 sps:$4 sm:$0xff]  }
  0xb1   :  { %v166_v30 = vsub.s32 %v162_v17, %v165_v28  ;;  %v3095_v17 = vld [vmem:[%s4372_s3 + $0x300] ss:$8 sps:$4 sm:$0xff]  }
  0xb2   :  { %1286 = vmatpush1.bf16.msra.mxu0 %v3059_v23  ;;  %v317_v23 = vpack.c.bf16 %v76_v14, %v76_v14  ;;  %v3143_v14 = vld [vmem:[%s4372_s3 + $0x380] ss:$8 sps:$4 sm:$0xff]  }
  0xb3   :  { %1325 = vmatpush1.bf16.msra.mxu1 %v3062_v25  ;;  %1287 = vmatprep.subr.bf16.mxu0 %v3067_v26  ;;  %v168_v34 = vsub.s32 0, %v166_v30  ;;  %v3106_v25 = vld [vmem:[%s4372_s3 + $0x484] ss:$8 sps:$4 sm:$0xff]  }
  0xb4   :  { %1326 = vmatprep.subr.bf16.mxu1 %v3070_v27  ;;  %v3101_v27 = vld [vmem:[%s4372_s3 + $0x310] ss:$8 sps:$4 sm:$0xff]  }
  0xb5   :  { %v2602_v36 = vmin.u32 %v168_v34, %v166_v30 }
  0xb6   :  { %1288 = vmatpush1.bf16.msra.mxu0 %v3065_v29  ;;  %v3104_v29 = vld [vmem:[%s4372_s3 + $0x480] ss:$8 sps:$4 sm:$0xff]  }
  0xb7   :  { %1327 = vmatpush1.bf16.msra.mxu1 %v3068_v31  ;;  %1289 = vmatprep.subr.bf16.mxu0 %v3073_v32  ;;  %v170_v41 = vclz %v2602_v36  ;;  %v314_v31 = vpack.c.bf16 %v3469_v39, %v3469_v39  ;;  %v3112_v32 = vld [vmem:[%s4372_s3 + $0x494] ss:$8 sps:$4 sm:$0xff]   ;;  %v3107_v36 = vld [vmem:[%s4372_s3 + $0x320] ss:$8 sps:$4 sm:$0xff]  }
  0xb8   :  { %1328 = vmatprep.subr.bf16.mxu1 %v3076_v33  ;;  %v3167_v33 = vld [vmem:[%s4372_s3 + $0x3f0] ss:$8 sps:$4 sm:$0xff]  }
  0xb9   :  { %v2603_v43 = vadd.s32 4294967294, %v170_v41  ;;  %v3113_v41 = vld [vmem:[%s4372_s3 + $0x330] ss:$8 sps:$4 sm:$0xff]  }
  0xba   :  { %1290 = vmatpush1.bf16.msra.mxu0 %v3071_v35  ;;  %v188_v35 = vsub.s32 4, %v3607_v24 }
  0xbb   :  { %1329 = vmatpush1.bf16.msra.mxu1 %v3074_v37  ;;  %1291 = vmatprep.subr.bf16.mxu0 %v3079_v38  ;;  %vm2604_vm9 = vcmp.lt.s32.totalorder %v2603_v43, 0  ;;  %v3115_v37 = vld [vmem:[%s4372_s3 + $0x334] ss:$8 sps:$4 sm:$0xff]   ;;  %v3118_v38 = vld [vmem:[%s4372_s3 + $0x4a4] ss:$8 sps:$4 sm:$0xff]  }
  0xbc   :  { %1330 = vmatprep.subr.bf16.mxu1 %v3082_v40  ;;  %v173_v54 = vsel %vm2604_vm9, 0, %v2603_v43  ;;  %v189_v40 = vsel %vm104_vm10, %v188_v35, %v3607_v24  ;;  %v3121_v43 = vld [vmem:[%s4372_s3 + $0x344] ss:$8 sps:$4 sm:$0xff]   ;;  %v3124_v24 = vld [vmem:[%s4372_s3 + $0x4b4] ss:$8 sps:$4 sm:$0xff]  }
  0xbd   :  { %v174_v60 = vsub.s32 32, %v173_v54  ;;  %v175_v61 = vshll.u32 %v166_v30, %v173_v54  ;;  %v178_v62 = vsub.s32 4294967266, %v173_v54  ;;  %v3109_v30 = vld [vmem:[%s4372_s3 + $0x324] ss:$8 sps:$4 sm:$0xff]  }
  0xbe   :  { %1292 = vmatpush1.bf16.msra.mxu0 %v3077_v42  ;;  %v3116_v42 = vld [vmem:[%s4372_s3 + $0x4a0] ss:$8 sps:$4 sm:$0xff]  }
  0xbf   :  { %1331 = vmatpush1.bf16.msra.mxu1 %v3080_v44  ;;  %1293 = vmatprep.subr.bf16.mxu0 %v3085_v45  ;;  %v176_v7 = vshrl.u32 %v158_v51, %v174_v60  ;;  %v179_v8 = vadd.s32 127, %v178_v62  ;;  %v3119_v44 = vld [vmem:[%s4372_s3 + $0x340] ss:$8 sps:$4 sm:$0xff]   ;;  %v3133_v60 = vld [vmem:[%s4372_s3 + $0x364] ss:$8 sps:$4 sm:$0xff]  }
  0xc0   :  { %1332 = vmatprep.subr.bf16.mxu1 %v3088_v49  ;;  %v3127_v49 = vld [vmem:[%s4372_s3 + $0x354] ss:$8 sps:$4 sm:$0xff]   ;;  %v1546_v35 = vld [vmem:[%s4375_s5] sm:$0xff] }
  0xc1   :  { %v177_v10 = vor.u32 %v176_v7, %v175_v61  ;;  %v180_v11 = vshll.u32 %v179_v8, 23  ;;  %v3136_v61 = vld [vmem:[%s4372_s3 + $0x4d4] ss:$8 sps:$4 sm:$0xff]  }
  0xc2   :  { %1294 = vmatpush1.bf16.msra.mxu0 %v3083_v55 }
  0xc3   :  { %1333 = vmatpush1.bf16.msra.mxu1 %v3086_v63  ;;  %1295 = vmatprep.subr.bf16.mxu0 %v3091_v0  ;;  %v181_v15 = vor.u32 4788187, %v180_v11  ;;  %v184_v16 = vcvt.s32.f32 %v177_v10  ;;  %v3131_v0 = vld [vmem:[%s4372_s3 + $0x360] ss:$8 sps:$4 sm:$0xff]   ;;  %v3137_v10 = vld [vmem:[%s4372_s3 + $0x370] ss:$8 sps:$4 sm:$0xff]  }
  0xc4   :  { %1334 = vmatprep.subr.bf16.mxu1 %v3094_v4  ;;  %v3139_v4 = vld [vmem:[%s4372_s3 + $0x374] ss:$8 sps:$4 sm:$0xff]   ;;  %v3140_v11 = vld [vmem:[%s4372_s3 + $0x4e0] ss:$8 sps:$4 sm:$0xff]  }
  0xc5   :  { %v182_v19 = vand.u32 2147483647, %v181_v15 }
  0xc6   :  { %1296 = vmatpush1.bf16.msra.mxu0 %v3089_v9 }
  0xc7   :  { %1335 = vmatpush1.bf16.msra.mxu1 %v3092_v12  ;;  %1347 = vmatprep.subr.bf16.mxu0 %v3097_v2  ;;  %v185_v26 = vmul.f32 %v184_v16, %v182_v19  ;;  %v3145_v12 = vld [vmem:[%s4372_s3 + $0x384] ss:$8 sps:$4 sm:$0xff]   ;;  %v3151_v19 = vld [vmem:[%s4372_s3 + $0x394] ss:$8 sps:$4 sm:$0xff]  }
  0xc8   :  { %1336 = vmatprep.subr.bf16.mxu1 %v3100_v18  ;;  %v3148_v18 = vld [vmem:[%s4372_s3 + $0x4f4] ss:$8 sps:$4 sm:$0xff]  }
  0xc9   :  { %1298 = vmatmul.mubr.bf16.vlgmr.msra.gmra.mrb[4].mxu0 %v312_v20  ;;  %v186_v28 = vxor.u32 2147483648, %v185_v26  ;;  %v3149_v20 = vld [vmem:[%s4372_s3 + $0x390] ss:$8 sps:$4 sm:$0xff]  }
  0xca   :  { %1348 = vmatpush1.bf16.msra.mxu0 %v3095_v17  ;;  %1379 = vmatprep.mubr.bf16.mxu0 %v317_v23  ;;  %v3146_v17 = vld [vmem:[%s4372_s3 + $0x4f0] ss:$8 sps:$4 sm:$0xff]   ;;  %v3152_v23 = vld [vmem:[%s4372_s3 + $0x3a0] ss:$8 sps:$4 sm:$0xff]  }
  0xcb   :  { %1337 = vmatpush1.bf16.msra.mxu1 %v3098_v21  ;;  %1349 = vmatprep.subr.bf16.mxu0 %v3103_v22  ;;  %v187_v34 = vsel %vm104_vm10, %v186_v28, %v185_v26  ;;  %v3154_v21 = vld [vmem:[%s4372_s3 + $0x3a4] ss:$8 sps:$4 sm:$0xff]   ;;  %v3163_v28 = vld [vmem:[%s4372_s3 + $0x3d4] ss:$8 sps:$4 sm:$0xff]  }
  0xcc   :  { %1485 = vmatprep.subr.bf16.mxu1 %v3106_v25  ;;  %v190_v39 = vsel %vm3726_vm11, %v3479_v47, %v187_v34  ;;  %v3155_v25 = vld [vmem:[%s4372_s3 + $0x3b0] ss:$8 sps:$4 sm:$0xff]   ;;  %v3160_v26 = vld [vmem:[%s4372_s3 + $0x3c4] ss:$8 sps:$4 sm:$0xff]   ;;  %v316_v34 = vpack.c.bf16 %v3477_v46, %v3477_v46 }
  0xcd   :  { %3172 = vcosq.f32 %v190_v39  ;;  %v1554_v46 = vld [vmem:[%s4375_s5 + $0x40] sm:$0xff] }
  0xce   :  { %1339 = vmatmul.mubr.bf16.vlgmr.msra.gmra.mrb[4].mxu1 %v314_v31  ;;  %1350 = vmatpush1.bf16.msra.mxu0 %v3101_v27  ;;  %3174 = vsinq.f32 %v190_v39  ;;  %v3158_v27 = vld [vmem:[%s4372_s3 + $0x3c0] ss:$8 sps:$4 sm:$0xff]  }
  0xcf   :  { %1486 = vmatpush1.bf16.msra.mxu1 %v3104_v29  ;;  %1351 = vmatprep.subr.bf16.mxu0 %v3109_v30  ;;  %v3161_v29 = vld [vmem:[%s4372_s3 + $0x3d0] ss:$8 sps:$4 sm:$0xff]   ;;  %v3166_v30 = vld [vmem:[%s4372_s3 + $0x3e4] ss:$8 sps:$4 sm:$0xff]   ;;  %v3164_v31 = vld [vmem:[%s4372_s3 + $0x3e0] ss:$8 sps:$4 sm:$0xff]  }
  0xd0   :  { %1487 = vmatprep.subr.bf16.mxu1 %v3112_v32  ;;  %1517 = vmatprep.mubr.bf16.mxu1 %v3186_v1  ;;  %v191_v1 = vsel %vm3726_vm11, 0, %v189_v40  ;;  %v3169_v32 = vld [vmem:[%s4372_s3 + $0x3f4] ss:$8 sps:$4 sm:$0xff]   ;;  %v1550_v39 = vld [vmem:[%s4375_s5 + $0x20] sm:$0xff] }
  0xd1   :  { %v195_v45 = vadd.s32 3, %v191_v1  ;;  %v299_v55 = vand.u32 3, %v191_v1  ;;  %v1558_v40 = vld [vmem:[%s4375_s5 + $0x60] sm:$0xff]  ;;  %v1555_v1 = vld [vmem:[%s4375_s5 + $0x48] sm:$0xff] }
  0xd2   :  { %1352 = vmatpush1.bf16.msra.mxu0 %v3107_v36  ;;  %v1547_v36 = vld [vmem:[%s4375_s5 + $0x8] sm:$0xff] }
  0xd3   :  { %1488 = vmatpush1.bf16.msra.mxu1 %v3110_v58  ;;  %1353 = vmatprep.subr.bf16.mxu0 %v3115_v37  ;;  %v196_v54 = vand.u32 3, %v195_v45  ;;  %vm301_vm14 = vcmp.eq.s32.totalorder %v299_v55, 0  ;;  %vm304_vm15 = vcmp.eq.s32.totalorder %v299_v55, 2  ;;  %vm300_vm2 = vcmp.lt.s32.totalorder %v299_v55, 2  ;;  %v1570_v55 = vld [vmem:[%s4375_s5 + $0xc0] sm:$0xff] }
  0xd4   :  { %1489 = vmatprep.subr.bf16.mxu1 %v3118_v38  ;;  %v2772_v58 = vcombine.low %v1546_v35, %v1550_v39  ;;  %v2773_v37 = vcombine.high %v1546_v35, %v1550_v39  ;;  %v1551_v38 = vld [vmem:[%s4375_s5 + $0x28] sm:$0xff]  ;;  %v1610_v39 = vld [vmem:[%s4375_s5 + $0x200] sm:$0xff] }
  0xd5   :  { %vm198_vm12 = vcmp.eq.s32.totalorder %v196_v54, 0  ;;  %vm201_vm13 = vcmp.eq.s32.totalorder %v196_v54, 2  ;;  %vm197_vm1 = vcmp.lt.s32.totalorder %v196_v54, 2 }
  0xd6   :  { %1354 = vmatpush1.bf16.msra.mxu0 %v3113_v41  ;;  %v2774_v41 = vcombine.low %v1547_v36, %v1551_v38 }
  0xd7   :  { %1490 = vmatpush1.bf16.msra.mxu1 %v3116_v42  ;;  %1355 = vmatprep.subr.bf16.mxu0 %v3121_v43  ;;  %v3173_v51 = vpop.eup %3172  ;;  %v2775_v42 = vcombine.high %v1547_v36, %v1551_v38  ;;  %v2781_v43 = vcombine.high %v1554_v46, %v1558_v40  ;;  %v1614_v36 = vld [vmem:[%s4375_s5 + $0x220] sm:$0xff]  ;;  %v1615_v38 = vld [vmem:[%s4375_s5 + $0x228] sm:$0xff] }
  0xd8   :  { %1491 = vmatprep.subr.bf16.mxu1 %v3124_v24  ;;  %v3175_v52 = vpop.eup %3174  ;;  %v202_v63 = vxor.u32 2147483648, %v3173_v51  ;;  %v1559_v24 = vld [vmem:[%s4375_s5 + $0x68] sm:$0xff] }
  0xd9   :  { %v199_v62 = vxor.u32 2147483648, %v3175_v52  ;;  %v2783_v45 = vcombine.high %v1555_v1, %v1559_v24 }
  0xda   :  { %1356 = vmatpush1.bf16.msra.mxu0 %v3119_v44  ;;  %v203_v7 = vsel %vm201_vm13, %v202_v63, %v3175_v52  ;;  %v306_v9 = vsel %vm304_vm15, %v202_v63, %v3175_v52  ;;  %v1562_v44 = vld [vmem:[%s4375_s5 + $0x80] sm:$0xff]  ;;  %v2782_v52 = vcombine.low %v1555_v1, %v1559_v24  ;;  %v1623_v1 = vld [vmem:[%s4375_s5 + $0x268] sm:$0xff] }
  0xdb   :  { %1492 = vmatpush1.bf16.msra.mxu1 %v3122_v48  ;;  %1357 = vmatprep.subr.bf16.mxu0 %v3127_v49  ;;  %v200_v6 = vsel %vm198_vm12, %v3173_v51, %v199_v62  ;;  %v303_v8 = vsel %vm301_vm14, %v3173_v51, %v199_v62  ;;  %v1566_v48 = vld [vmem:[%s4375_s5 + $0xa0] sm:$0xff]  ;;  %v1563_v49 = vld [vmem:[%s4375_s5 + $0x88] sm:$0xff]  ;;  %v2780_v51 = vcombine.low %v1554_v46, %v1558_v40 }
  0xdc   :  { %1493 = vmatprep.subr.bf16.mxu1 %v3130_v50  ;;  %v204_v13 = vsel %vm197_vm1, %v200_v6, %v203_v7  ;;  %v307_v2 = vsel %vm300_vm2, %v303_v8, %v306_v9  ;;  %v1567_v50 = vld [vmem:[%s4375_s5 + $0xa8] sm:$0xff]  ;;  %v2788_v62 = vcombine.low %v1562_v44, %v1566_v48  ;;  %v1618_v46 = vld [vmem:[%s4375_s5 + $0x240] sm:$0xff] }
  0xdd   :  { %v205_v15 = vsel %vm194_vm3, nan, %v204_v13  ;;  %v308_v16 = vsel %vm194_vm3, nan, %v307_v2  ;;  %v2791_v54 = vcombine.high %v1563_v49, %v1567_v50  ;;  %v2790_v63 = vcombine.low %v1563_v49, %v1567_v50  ;;  %v1579_v6 = vld [vmem:[%s4375_s5 + $0x108] sm:$0xff]  ;;  %v1590_v13 = vld [vmem:[%s4375_s5 + $0x160] sm:$0xff] }
  0xde   :  { %1358 = vmatpush1.bf16.msra.mxu0 %v3125_v53  ;;  %v309_v47 = vsel %vm90_vm0, %v205_v15, %v308_v16  ;;  %v2789_v53 = vcombine.high %v1562_v44, %v1566_v48  ;;  %v1583_v7 = vld [vmem:[%s4375_s5 + $0x128] sm:$0xff]  ;;  %v1622_v40 = vld [vmem:[%s4375_s5 + $0x260] sm:$0xff] }
  0xdf   :  { %1494 = vmatpush1.bf16.msra.mxu1 %v3128_v59  ;;  %1359 = vmatprep.subr.bf16.mxu0 %v3133_v60  ;;  %v1388_v22 = vpack.c.bf16 %v309_v47, %v309_v47  ;;  %v1574_v59 = vld [vmem:[%s4375_s5 + $0xe0] sm:$0xff]  ;;  %v1571_v60 = vld [vmem:[%s4375_s5 + $0xc8] sm:$0xff]  ;;  %v2806_v15 = vcombine.low %v1579_v6, %v1583_v7  ;;  %v2845_v44 = vcombine.high %v1618_v46, %v1622_v40 }
  0xe0   :  { %1495 = vmatprep.subr.bf16.mxu1 %v3136_v61  ;;  %v1575_v61 = vld [vmem:[%s4375_s5 + $0xe8] sm:$0xff]  ;;  %v2796_v8 = vcombine.low %v1570_v55, %v1574_v59  ;;  %v1598_v47 = vld [vmem:[%s4375_s5 + $0x1a0] sm:$0xff] }
  0xe1   :  { %v2798_v9 = vcombine.low %v1571_v60, %v1575_v61  ;;  %v1587_v2 = vld [vmem:[%s4375_s5 + $0x148] sm:$0xff]  ;;  %v1626_v48 = vld [vmem:[%s4375_s5 + $0x280] sm:$0xff] }
  0xe2   :  { %1360 = vmatpush1.bf16.msra.mxu0 %v3131_v0  ;;  %v2797_v0 = vcombine.high %v1570_v55, %v1574_v59  ;;  %v1630_v49 = vld [vmem:[%s4375_s5 + $0x2a0] sm:$0xff]  ;;  %v1627_v50 = vld [vmem:[%s4375_s5 + $0x288] sm:$0xff] }
  0xe3   :  { %1496 = vmatpush1.bf16.msra.mxu1 %v3134_v3  ;;  %1361 = vmatprep.subr.bf16.mxu0 %v3139_v4  ;;  %v2799_v3 = vcombine.high %v1571_v60, %v1575_v61  ;;  %v1578_v4 = vld [vmem:[%s4375_s5 + $0x100] sm:$0xff]  ;;  %v1635_v61 = vld [vmem:[%s4375_s5 + $0x2c8] sm:$0xff] }
  0xe4   :  { %1497 = vmatprep.subr.bf16.mxu1 %v3142_v5  ;;  %v1582_v5 = vld [vmem:[%s4375_s5 + $0x120] sm:$0xff] }
  0xe5   :  { %v1634_v59 = vld [vmem:[%s4375_s5 + $0x2c0] sm:$0xff] }
  0xe6   :  { %1362 = vmatpush1.bf16.msra.mxu0 %v3137_v10  ;;  %v2805_v10 = vcombine.high %v1578_v4, %v1582_v5  ;;  %v1638_v60 = vld [vmem:[%s4375_s5 + $0x2e0] sm:$0xff] }
  0xe7   :  { %1498 = vmatpush1.bf16.msra.mxu1 %v3140_v11  ;;  %1363 = vmatprep.subr.bf16.mxu0 %v3145_v12  ;;  %v2807_v11 = vcombine.high %v1579_v6, %v1583_v7  ;;  %v1586_v12 = vld [vmem:[%s4375_s5 + $0x140] sm:$0xff]  ;;  %v1643_v7 = vld [vmem:[%s4375_s5 + $0x308] sm:$0xff] }
  0xe8   :  { %1499 = vmatprep.subr.bf16.mxu1 %v3148_v18  ;;  %v1591_v18 = vld [vmem:[%s4375_s5 + $0x168] sm:$0xff]  ;;  %v2813_v16 = vcombine.high %v1586_v12, %v1590_v13  ;;  %v1646_v6 = vld [vmem:[%s4375_s5 + $0x320] sm:$0xff] }
  0xea   :  { %1364 = vmatpush1.bf16.msra.mxu0 %v3143_v14  ;;  %v2804_v14 = vcombine.low %v1578_v4, %v1582_v5  ;;  %v1642_v5 = vld [vmem:[%s4375_s5 + $0x300] sm:$0xff] }
  0xeb   :  { %1500 = vmatpush1.bf16.msra.mxu1 %v3146_v17  ;;  %1365 = vmatprep.subr.bf16.mxu0 %v3151_v19  ;;  %v2815_v17 = vcombine.high %v1587_v2, %v1591_v18  ;;  %v1594_v19 = vld [vmem:[%s4375_s5 + $0x180] sm:$0xff] }
  0xec   :  { %2397 = vmatprep.subr.bf16.mxu1 %v2775_v42 }
  0xee   :  { %1366 = vmatpush1.bf16.msra.mxu0 %v3149_v20  ;;  %1518 = vmatmul.mubr.bf16.vlgmr.msra.gmra.mrb[8].mxu1 %v1388_v22  ;;  %v1595_v20 = vld [vmem:[%s4375_s5 + $0x188] sm:$0xff]  ;;  %v2812_v22 = vcombine.low %v1586_v12, %v1590_v13  ;;  %v2868_v13 = vcombine.low %v1642_v5, %v1646_v6 }
  0xef   :  { %1367 = vmatprep.subr.bf16.mxu0 %v3154_v21  ;;  %2398 = vmatpush1.bf16.msra.mxu1 %v2774_v41  ;;  %v1599_v21 = vld [vmem:[%s4375_s5 + $0x1a8] sm:$0xff]  ;;  %v2836_v41 = vcombine.low %v1610_v39, %v1614_v36 }
  0xf0   :  { %2399 = vmatprep.subr.bf16.mxu1 %v2783_v45 }
  0xf2   :  { %1368 = vmatpush1.bf16.msra.mxu0 %v3152_v23  ;;  %v2814_v23 = vcombine.low %v1587_v2, %v1591_v18  ;;  %v1650_v18 = vld [vmem:[%s4375_s5 + $0x340] sm:$0xff] }
  0xf3   :  { %1369 = vmatprep.subr.bf16.mxu0 %v3157_v57  ;;  %2400 = vmatpush1.bf16.msra.mxu1 %v2782_v52  ;;  %v2821_v57 = vcombine.high %v1594_v19, %v1598_v47  ;;  %v2844_v52 = vcombine.low %v1618_v46, %v1622_v40  ;;  %v1671_v40 = vld [vmem:[%s4375_s5 + $0x3e8] sm:$0xff] }
  0xf4   :  { %2401 = vmatprep.subr.bf16.mxu1 %v2791_v54  ;;  %v2853_v54 = vcombine.high %v1626_v48, %v1630_v49 }
  0xf6   :  { %1370 = vmatpush1.bf16.msra.mxu0 %v3155_v25  ;;  %v2823_v25 = vcombine.high %v1595_v20, %v1599_v21 }
  0xf7   :  { %1371 = vmatprep.subr.bf16.mxu0 %v3160_v26  ;;  %2402 = vmatpush1.bf16.msra.mxu1 %v2790_v63  ;;  %v2820_v26 = vcombine.low %v1594_v19, %v1598_v47  ;;  %v2852_v63 = vcombine.low %v1626_v48, %v1630_v49  ;;  %v1553_v49 = vld [vmem:[%s4375_s5 + $0x38] sm:$0xff] }
  0xf8   :  { %2403 = vmatprep.subr.bf16.mxu1 %v2799_v3  ;;  %v2861_v3 = vcombine.high %v1634_v59, %v1638_v60 }
  0xfa   :  { %1372 = vmatpush1.bf16.msra.mxu0 %v3158_v27  ;;  %v2822_v27 = vcombine.low %v1595_v20, %v1599_v21 }
  0xfb   :  { %1373 = vmatprep.subr.bf16.mxu0 %v3163_v28  ;;  %2404 = vmatpush1.bf16.msra.mxu1 %v2798_v9  ;;  %v1602_v28 = vld [vmem:[%s4375_s5 + $0x1c0] sm:$0xff]  ;;  %v2860_v9 = vcombine.low %v1634_v59, %v1638_v60 }
  0xfc   :  { %2405 = vmatprep.subr.bf16.mxu1 %v2807_v11  ;;  %v2869_v11 = vcombine.high %v1642_v5, %v1646_v6  ;;  %v3196_v6 = vmov 5  }
  0xfd   :  { %2929 = vset.pattern.permute.xlu0 %v3196_v6  ;;  %v1596_v6 = vld [vmem:[%s4375_s5 + $0x190] sm:$0xff] }
  0xfe   :  { %1374 = vmatpush1.bf16.msra.mxu0 %v3161_v29  ;;  %v1606_v29 = vld [vmem:[%s4375_s5 + $0x1e0] sm:$0xff] }
  0xff   :  { %1375 = vmatprep.subr.bf16.mxu0 %v3166_v30  ;;  %2406 = vmatpush1.bf16.msra.mxu1 %v2806_v15  ;;  %v1603_v30 = vld [vmem:[%s4375_s5 + $0x1c8] sm:$0xff] }
 0x100   :  { %2407 = vmatprep.subr.bf16.mxu1 %v2815_v17  ;;  %v1651_v15 = vld [vmem:[%s4375_s5 + $0x348] sm:$0xff] }
 0x101   :  { %v1655_v17 = vld [vmem:[%s4375_s5 + $0x368] sm:$0xff] }
 0x102   :  { %1376 = vmatpush1.bf16.msra.mxu0 %v3164_v31  ;;  %v2829_v31 = vcombine.high %v1602_v28, %v1606_v29  ;;  %v2878_v20 = vcombine.low %v1651_v15, %v1655_v17  ;;  %v2879_v21 = vcombine.high %v1651_v15, %v1655_v17 }
 0x103   :  { %1377 = vmatprep.subr.bf16.mxu0 %v3169_v32  ;;  %2408 = vmatpush1.bf16.msra.mxu1 %v2814_v23  ;;  %v1607_v32 = vld [vmem:[%s4375_s5 + $0x1e8] sm:$0xff] }
 0x104   :  { %2409 = vmatprep.subr.bf16.mxu1 %v2823_v25  ;;  %v2831_v35 = vcombine.high %v1603_v30, %v1607_v32  ;;  %v1662_v25 = vld [vmem:[%s4375_s5 + $0x3a0] sm:$0xff] }
 0x106   :  { %1378 = vmatpush1.bf16.msra.mxu0 %v3167_v33  ;;  %v2828_v33 = vcombine.low %v1602_v28, %v1606_v29  ;;  %v1663_v29 = vld [vmem:[%s4375_s5 + $0x3a8] sm:$0xff] }
 0x107   :  { %2356 = vmatprep.subr.bf16.mxu0 %v2773_v37  ;;  %2410 = vmatpush1.bf16.msra.mxu1 %v2822_v27  ;;  %v2837_v37 = vcombine.high %v1610_v39, %v1614_v36  ;;  %v1666_v39 = vld [vmem:[%s4375_s5 + $0x3c0] sm:$0xff] }
 0x108   :  { %2411 = vmatprep.subr.bf16.mxu1 %v2831_v35  ;;  %v1670_v36 = vld [vmem:[%s4375_s5 + $0x3e0] sm:$0xff] }
 0x109   :  { %1380 = vmatmul.mubr.bf16.vlgmr.msra.gmra.mrb[8].mxu0 %v316_v34  ;;  %v2830_v34 = vcombine.low %v1603_v30, %v1607_v32  ;;  %v2893_v46 = vcombine.high %v1666_v39, %v1670_v36 }
 0x10a   :  { %2357 = vmatpush1.bf16.msra.mxu0 %v2772_v58  ;;  %v1611_v58 = vld [vmem:[%s4375_s5 + $0x208] sm:$0xff] }
 0x10b   :  { %2358 = vmatprep.subr.bf16.mxu0 %v2781_v43  ;;  %v2839_v42 = vcombine.high %v1611_v58, %v1615_v38  ;;  %v1619_v43 = vld [vmem:[%s4375_s5 + $0x248] sm:$0xff]  ;;  %2412 = vmatpush1.bf16.msra.mxu1 %v2830_v34  ;;  %v2838_v24 = vcombine.low %v1611_v58, %v1615_v38 }
 0x10c   :  { %v2847_v45 = vcombine.high %v1619_v43, %v1623_v1  ;;  %v1667_v58 = vld [vmem:[%s4375_s5 + $0x3c8] sm:$0xff] }
 0x10d   :  { %2413 = vmatprep.subr.bf16.mxu1 %v2839_v42  ;;  %v2892_v42 = vcombine.low %v1666_v39, %v1670_v36  ;;  %v1568_v39 = vld [vmem:[%s4375_s5 + $0xb0] sm:$0xff]  ;;  %v1565_v36 = vld [vmem:[%s4375_s5 + $0x98] sm:$0xff] }
 0x10e   :  { %2359 = vmatpush1.bf16.msra.mxu0 %v2780_v51  ;;  %v1631_v51 = vld [vmem:[%s4375_s5 + $0x2a8] sm:$0xff] }
 0x10f   :  { %2360 = vmatprep.subr.bf16.mxu0 %v2789_v53  ;;  %2414 = vmatpush1.bf16.msra.mxu1 %v2838_v24  ;;  %v2846_v53 = vcombine.low %v1619_v43, %v1623_v1  ;;  %v2855_v55 = vcombine.high %v1627_v50, %v1631_v51  ;;  %v2894_v43 = vcombine.low %v1667_v58, %v1671_v40  ;;  %v4062_v24 = vld [vmem:[%s4375_s5 + $0x10] sm:$0xff] }
 0x110   :  { %2415 = vmatprep.subr.bf16.mxu1 %v2847_v45  ;;  %v2895_v1 = vcombine.high %v1667_v58, %v1671_v40  ;;  %v4072_v45 = vld [vmem:[%s4375_s5 + $0x18] sm:$0xff] }
 0x111   :  { %v1569_v58 = vld [vmem:[%s4375_s5 + $0xb8] sm:$0xff] }
 0x112   :  { %2361 = vmatpush1.bf16.msra.mxu0 %v2788_v62  ;;  %v1639_v62 = vld [vmem:[%s4375_s5 + $0x2e8] sm:$0xff]  ;;  %v2795_v40 = vcombine.high %v1565_v36, %v1569_v58 }
 0x113   :  { %2362 = vmatprep.subr.bf16.mxu0 %v2797_v0  ;;  %2416 = vmatpush1.bf16.msra.mxu1 %v2846_v53  ;;  %v2854_v0 = vcombine.low %v1627_v50, %v1631_v51  ;;  %v2863_v4 = vcombine.high %v1635_v61, %v1639_v62  ;;  %v2778_v51 = vcombine.low %v4072_v45, %v1553_v49 }
 0x114   :  { %2417 = vmatprep.subr.bf16.mxu1 %v2855_v55 }
 0x116   :  { %2363 = vmatpush1.bf16.msra.mxu0 %v2796_v8  ;;  %v1647_v8 = vld [vmem:[%s4375_s5 + $0x328] sm:$0xff] }
 0x117   :  { %2364 = vmatprep.subr.bf16.mxu0 %v2805_v10  ;;  %2418 = vmatpush1.bf16.msra.mxu1 %v2854_v0  ;;  %v2862_v10 = vcombine.low %v1635_v61, %v1639_v62  ;;  %v2871_v12 = vcombine.high %v1643_v7, %v1647_v8  ;;  %v2870_v2 = vcombine.low %v1643_v7, %v1647_v8  ;;  %v3176_v7 = vld [vmem:[%s4371_s2] sm:$0xff] }
 0x118   :  { %2419 = vmatprep.subr.bf16.mxu1 %v2863_v4  ;;  %2577 = vperm.xlu0 %2929, %v3176_v7   ;;  %v1600_v7 = vld [vmem:[%s4375_s5 + $0x1b0] sm:$0xff] }
 0x11a   :  { %2365 = vmatpush1.bf16.msra.mxu0 %v2804_v14  ;;  %v1654_v14 = vld [vmem:[%s4375_s5 + $0x360] sm:$0xff] }
 0x11b   :  { %2366 = vmatprep.subr.bf16.mxu0 %v2813_v16  ;;  %2420 = vmatpush1.bf16.msra.mxu1 %v2862_v10  ;;  %v2877_v16 = vcombine.high %v1650_v18, %v1654_v14  ;;  %v2876_v47 = vcombine.low %v1650_v18, %v1654_v14 }
 0x11c   :  { %2421 = vmatprep.subr.bf16.mxu1 %v2871_v12  ;;  %v4087_v12 = vshrl.u32 %v77_v56, 7 }
 0x11e   :  { %2367 = vmatpush1.bf16.msra.mxu0 %v2812_v22  ;;  %v1536_v18 = vsub.s32 1, %v4087_v12 }
 0x11f   :  { %2368 = vmatprep.subr.bf16.mxu0 %v2821_v57  ;;  %2422 = vmatpush1.bf16.msra.mxu1 %v2870_v2  ;;  %v1658_v57 = vld [vmem:[%s4375_s5 + $0x380] sm:$0xff] }
 0x120   :  { %2423 = vmatprep.subr.bf16.mxu1 %v2879_v21  ;;  %v2885_v28 = vcombine.high %v1658_v57, %v1662_v25  ;;  %v2884_v30 = vcombine.low %v1658_v57, %v1662_v25  ;;  %v1528_v2 = vld [vmem:[%s4376_s4] sm:$0x3] }
 0x122   :  { %2369 = vmatpush1.bf16.msra.mxu0 %v2820_v26  ;;  %v1659_v26 = vld [vmem:[%s4375_s5 + $0x388] sm:$0xff] }
 0x123   :  { %2370 = vmatprep.subr.bf16.mxu0 %v2829_v31  ;;  %2424 = vmatpush1.bf16.msra.mxu1 %v2878_v20  ;;  %v2886_v31 = vcombine.low %v1659_v26, %v1663_v29  ;;  %v2887_v32 = vcombine.high %v1659_v26, %v1663_v29  ;;  %v1557_v29 = vld [vmem:[%s4375_s5 + $0x58] sm:$0xff] }
 0x125   :  { %2425 = vmatprep.subr.bf16.mxu1 %v2887_v32 }
 0x126   :  { %2371 = vmatpush1.bf16.msra.mxu0 %v2828_v33 }
 0x127   :  { %2372 = vmatprep.subr.bf16.mxu0 %v2837_v37  ;;  %2426 = vmatpush1.bf16.msra.mxu1 %v2886_v31 }
 0x128   :  { %2427 = vmatprep.subr.bf16.mxu1 %v2895_v1  ;;  %v1577_v1 = vld [vmem:[%s4375_s5 + $0xf8] sm:$0xff] }
 0x12a   :  { %2373 = vmatpush1.bf16.msra.mxu0 %v2836_v41 }
 0x12b   :  { %2374 = vmatprep.subr.bf16.mxu0 %v2845_v44  ;;  %v4067_v44 = vld [vmem:[%s4375_s5 + $0x30] sm:$0xff]  ;;  %2428 = vmatpush1.bf16.msra.mxu1 %v2894_v43  ;;  %v1573_v43 = vld [vmem:[%s4375_s5 + $0xd8] sm:$0xff] }
 0x12c   :  { %v2777_v48 = vcombine.high %v4062_v24, %v4067_v44  ;;  %v2776_v50 = vcombine.low %v4062_v24, %v4067_v44  ;;  %v2794_v44 = vcombine.low %v1565_v36, %v1569_v58 }
 0x12e   :  { %2375 = vmatpush1.bf16.msra.mxu0 %v2844_v52  ;;  %v2779_v52 = vcombine.high %v4072_v45, %v1553_v49  ;;  %v1580_v49 = vld [vmem:[%s4375_s5 + $0x110] sm:$0xff] }
 0x12f   :  { %2376 = vmatprep.subr.bf16.mxu0 %v2853_v54 }
 0x130   :  { %2479 = vmatprep.subr.bf16.mxu1 %v2779_v52  ;;  %v1585_v52 = vld [vmem:[%s4375_s5 + $0x138] sm:$0xff] }
 0x132   :  { %2377 = vmatpush1.bf16.msra.mxu0 %v2852_v63 }
 0x133   :  { %2378 = vmatprep.subr.bf16.mxu0 %v2861_v3 }
 0x136   :  { %2379 = vmatpush1.bf16.msra.mxu0 %v2860_v9 }
 0x137   :  { %2380 = vmatprep.subr.bf16.mxu0 %v2869_v11 }
 0x13a   :  { %2381 = vmatpush1.bf16.msra.mxu0 %v2868_v13  ;;  %v1532_v13 = vsub.s32 0, %v4087_v12 }
 0x13b   :  { %2382 = vmatprep.subr.bf16.mxu0 %v2877_v16 }
 0x13c   :  { %v1533_v16 = vrot.slane %v1528_v2, %v1532_v13 }
 0x13e   :  { %2383 = vmatpush1.bf16.msra.mxu0 %v2876_v47  ;;  %v1537_v47 = vrot.slane %v1528_v2, %v1536_v18  ;;  %v2825_v2 = vcombine.high %v1596_v6, %v1600_v7 }
 0x13f   :  { %2384 = vmatprep.subr.bf16.mxu0 %v2885_v28  ;;  %v1560_v28 = vld [vmem:[%s4375_s5 + $0x70] sm:$0xff] }
 0x142   :  { %2385 = vmatpush1.bf16.msra.mxu0 %v2884_v30  ;;  %v1561_v30 = vld [vmem:[%s4375_s5 + $0x78] sm:$0xff] }
 0x143   :  { %2386 = vmatprep.subr.bf16.mxu0 %v2893_v46 }
 0x146   :  { %2387 = vmatpush1.bf16.msra.mxu0 %v2892_v42  ;;  %v1576_v42 = vld [vmem:[%s4375_s5 + $0xf0] sm:$0xff] }
 0x147   :  { %2438 = vmatprep.subr.bf16.mxu0 %v2777_v48  ;;  %v2803_v48 = vcombine.high %v1573_v43, %v1577_v1 }
 0x15c   :  { %v577_v19 = vpop.f32.mrb[0].mxu0 }
 0x15d   :  { %v579_v22 = vpop.f32.mrb[1].mxu0 }
 0x15e   :  { %v581_v23 = vpop.f32.mrb[2].mxu0 }
 0x15f   :  { %v582_v27 = vpop.f32.mrb[3].mxu0 }
 0x160   :  { %v1556_v27 = vld [vmem:[%s4375_s5 + $0x50] sm:$0xff] }
 0x161   :  { %v1258_v33 = vpop.f32.mrb[0].mxu1 }
 0x162   :  { %v1259_v34 = vadd.f32 %v1258_v33, %v577_v19  ;;  %v1260_v35 = vpop.f32.mrb[1].mxu1  ;;  %v1564_v33 = vld [vmem:[%s4375_s5 + $0x90] sm:$0xff] }
 0x163   :  { %v1261_v37 = vadd.f32 %v1260_v35, %v579_v22  ;;  %v1262_v38 = vpop.f32.mrb[2].mxu1  ;;  %v2787_v35 = vcombine.high %v1557_v29, %v1561_v30  ;;  %v2793_v46 = vcombine.high %v1564_v33, %v1568_v39  ;;  %v2792_v24 = vcombine.low %v1564_v33, %v1568_v39  ;;  %v1621_v33 = vld [vmem:[%s4375_s5 + $0x258] sm:$0xff] }
 0x164   :  { %v1263_v41 = vpop.f32.mrb[3].mxu1  ;;  %v2786_v38 = vcombine.low %v1557_v29, %v1561_v30  ;;  %v1620_v30 = vld [vmem:[%s4375_s5 + $0x250] sm:$0xff] }
 0x165   :  { %v1572_v41 = vld [vmem:[%s4375_s5 + $0xd0] sm:$0xff] }
 0x166   :  { %v2801_v45 = vcombine.high %v1572_v41, %v1576_v42 }
 0x19c   :  { %v1299_v53 = vpop.f32.mrb[4].mxu0 }
 0x19d   :  { %v1300_v54 = vadd.f32 %v1299_v53, %v1259_v34  ;;  %v1301_v55 = vpop.f32.mrb[5].mxu0  ;;  %v2785_v34 = vcombine.high %v1556_v27, %v1560_v28  ;;  %v2800_v53 = vcombine.low %v1572_v41, %v1576_v42 }
 0x19e   :  { %v1302_v59 = vadd.f32 %v1301_v55, %v1261_v37  ;;  %v1303_v60 = vpop.f32.mrb[6].mxu0  ;;  %v2784_v37 = vcombine.low %v1556_v27, %v1560_v28 }
 0x19f   :  { %v1304_v61 = vpop.f32.mrb[7].mxu0  ;;  %v1588_v60 = vld [vmem:[%s4375_s5 + $0x150] sm:$0xff] }
 0x1a0   :  { %v1592_v61 = vld [vmem:[%s4375_s5 + $0x170] sm:$0xff] }
 0x1a1   :  { %v1340_v62 = vpop.f32.mrb[4].mxu1 }
 0x1a2   :  { %v1341_v63 = vadd.f32 %v1340_v62, %v1300_v54  ;;  %v1342_v0 = vpop.f32.mrb[5].mxu1  ;;  %v2802_v54 = vcombine.low %v1573_v43, %v1577_v1  ;;  %v1589_v62 = vld [vmem:[%s4375_s5 + $0x158] sm:$0xff] }
 0x1a3   :  { %v1343_v3 = vadd.f32 %v1342_v0, %v1302_v59  ;;  %v1344_v4 = vpop.f32.mrb[6].mxu1 }
 0x1a4   :  { %v1345_v5 = vpop.f32.mrb[7].mxu1  ;;  %v2817_v4 = vcombine.high %v1588_v60, %v1592_v61 }
 0x1c1   :  { %v1519_v8 = vpop.f32.mrb[8].mxu1 }
 0x1c2   :  { %v1521_v9 = vpop.f32.mrb[9].mxu1 }
 0x1c3   :  { %v1523_v10 = vpop.f32.mrb[10].mxu1 }
 0x1c4   :  { %v1524_v11 = vpop.f32.mrb[11].mxu1  ;;  %v2816_v10 = vcombine.low %v1588_v60, %v1592_v61 }
 0x1dc   :  { %v1381_v14 = vpop.f32.mrb[8].mxu0 }
 0x1dd   :  { %v1382_v15 = vadd.f32 %v1381_v14, %v1341_v63  ;;  %v1383_v17 = vpop.f32.mrb[9].mxu0  ;;  %v1593_v63 = vld [vmem:[%s4375_s5 + $0x178] sm:$0xff] }
 0x1de   :  { %v1384_v19 = vadd.f32 %v1383_v17, %v1343_v3  ;;  %v1385_v56 = vpop.f32.mrb[10].mxu0  ;;  %v2819_v5 = vcombine.high %v1589_v62, %v1593_v63  ;;  %v2818_v11 = vcombine.low %v1589_v62, %v1593_v63  ;;  %v1605_v17 = vld [vmem:[%s4375_s5 + $0x1d8] sm:$0xff] }
 0x1df   :  { %v1526_v20 = vadd.f32 %v1519_v8, %v1382_v15  ;;  %v1386_v21 = vpop.f32.mrb[11].mxu0  ;;  %v1597_v8 = vld [vmem:[%s4375_s5 + $0x198] sm:$0xff]  ;;  %v1604_v15 = vld [vmem:[%s4375_s5 + $0x1d0] sm:$0xff] }
 0x1e0   :  { %v1527_v22 = vadd.f32 %v1521_v9, %v1384_v19  ;;  %v1601_v9 = vld [vmem:[%s4375_s5 + $0x1b8] sm:$0xff] }
 0x1e1   :  { %v1540_v23 = vadd.f32 %v1533_v16, %v1526_v20  ;;  %v2827_v14 = vcombine.high %v1597_v8, %v1601_v9  ;;  %v1608_v16 = vld [vmem:[%s4375_s5 + $0x1f0] sm:$0xff]  ;;  %v1609_v19 = vld [vmem:[%s4375_s5 + $0x1f8] sm:$0xff]  ;;  %v2826_v56 = vcombine.low %v1597_v8, %v1601_v9 }
 0x1e2   :  { %v1541_v57 = vadd.f32 %v1537_v47, %v1527_v22  ;;  %v2824_v47 = vcombine.low %v1596_v6, %v1600_v7  ;;  %v2833_v20 = vcombine.high %v1604_v15, %v1608_v16  ;;  %v2835_v21 = vcombine.high %v1605_v17, %v1609_v19  ;;  %v1612_v22 = vld [vmem:[%s4375_s5 + $0x210] sm:$0xff] }
 0x1e3   :  { %v1542_v25 = vmax.f32 %v1540_v23, 0.0  ;;  %v1616_v23 = vld [vmem:[%s4375_s5 + $0x230] sm:$0xff]  ;;  %v2834_v27 = vcombine.low %v1605_v17, %v1609_v19 }
 0x1e4   :  { %v1543_v26 = vmax.f32 %v1541_v57, 0.0  ;;  %v1613_v57 = vld [vmem:[%s4375_s5 + $0x218] sm:$0xff]  ;;  %v2841_v28 = vcombine.high %v1612_v22, %v1616_v23 }
 0x1e5   :  { %v4110_v32 = vpack.c.bf16 %v1542_v25, %v1542_v25  ;;  %v1617_v25 = vld [vmem:[%s4375_s5 + $0x238] sm:$0xff] }
 0x1e6   :  { %v1545_v31 = vpack.c.bf16 %v1543_v26, %v1543_v26  ;;  %v2832_v26 = vcombine.low %v1604_v15, %v1608_v16  ;;  %v2843_v29 = vcombine.high %v1613_v57, %v1617_v25  ;;  %v2842_v39 = vcombine.low %v1613_v57, %v1617_v25 }
 0x1e8   :  { %2388 = vmatprep.mubr.bf16.mxu0 %v1545_v31  ;;  %2429 = vmatprep.mubr.bf16.mxu1 %v1545_v31 }
 0x1e9   :  { %2389 = vmatmul.mubr.bf16.vlgmr.msra.gmra.mrb[12].mxu0 %v4110_v32  ;;  %2430 = vmatmul.mubr.bf16.vlgmr.msra.gmra.mrb[12].mxu1 %v4110_v32 }
 0x1ea   :  { %2439 = vmatpush1.bf16.msra.mxu0 %v2776_v50  ;;  %2480 = vmatpush1.bf16.msra.mxu1 %v2778_v51  ;;  %v1584_v50 = vld [vmem:[%s4375_s5 + $0x130] sm:$0xff]  ;;  %v1581_v51 = vld [vmem:[%s4375_s5 + $0x118] sm:$0xff] }
 0x1eb   :  { %2470 = vmatprep.mubr.bf16.mxu0 %v1545_v31  ;;  %2511 = vmatprep.mubr.bf16.mxu1 %v1545_v31  ;;  %v2809_v55 = vcombine.high %v1580_v49, %v1584_v50  ;;  %v2811_v59 = vcombine.high %v1581_v51, %v1585_v52  ;;  %v2808_v0 = vcombine.low %v1580_v49, %v1584_v50  ;;  %v1624_v31 = vld [vmem:[%s4375_s5 + $0x270] sm:$0xff] }
 0x1ec   :  { %2440 = vmatprep.subr.bf16.mxu0 %v2785_v34  ;;  %2481 = vmatprep.subr.bf16.mxu1 %v2787_v35  ;;  %v2810_v3 = vcombine.low %v1581_v51, %v1585_v52  ;;  %v1625_v34 = vld [vmem:[%s4375_s5 + $0x278] sm:$0xff]  ;;  %v2840_v35 = vcombine.low %v1612_v22, %v1616_v23  ;;  %v2849_v36 = vcombine.high %v1620_v30, %v1624_v31 }
 0x1ed   :  { %v2851_v58 = vcombine.high %v1621_v33, %v1625_v34  ;;  %v2848_v41 = vcombine.low %v1620_v30, %v1624_v31  ;;  %v2850_v42 = vcombine.low %v1621_v33, %v1625_v34  ;;  %v1690_v30 = vsub.s32 3, %v4087_v12 }
 0x1ee   :  { %2441 = vmatpush1.bf16.msra.mxu0 %v2784_v37  ;;  %2482 = vmatpush1.bf16.msra.mxu1 %v2786_v38  ;;  %v1628_v37 = vld [vmem:[%s4375_s5 + $0x290] sm:$0xff] }
 0x1ef   :  { %2442 = vmatprep.subr.bf16.mxu0 %v2793_v46  ;;  %2483 = vmatprep.subr.bf16.mxu1 %v2795_v40  ;;  %v1632_v38 = vld [vmem:[%s4375_s5 + $0x2b0] sm:$0xff]  ;;  %v1629_v46 = vld [vmem:[%s4375_s5 + $0x298] sm:$0xff] }
 0x1f0   :  { %v1633_v40 = vld [vmem:[%s4375_s5 + $0x2b8] sm:$0xff]  ;;  %v2857_v43 = vcombine.high %v1628_v37, %v1632_v38  ;;  %v2856_v49 = vcombine.low %v1628_v37, %v1632_v38 }
 0x1f1   :  { %v2859_v1 = vcombine.high %v1629_v46, %v1633_v40  ;;  %v2858_v50 = vcombine.low %v1629_v46, %v1633_v40 }
 0x1f2   :  { %2443 = vmatpush1.bf16.msra.mxu0 %v2792_v24  ;;  %2484 = vmatpush1.bf16.msra.mxu1 %v2794_v44  ;;  %v1636_v24 = vld [vmem:[%s4375_s5 + $0x2d0] sm:$0xff] }
 0x1f3   :  { %2444 = vmatprep.subr.bf16.mxu0 %v2801_v45  ;;  %2485 = vmatprep.subr.bf16.mxu1 %v2803_v48  ;;  %v1640_v44 = vld [vmem:[%s4375_s5 + $0x2f0] sm:$0xff]  ;;  %v1637_v45 = vld [vmem:[%s4375_s5 + $0x2d8] sm:$0xff] }
 0x1f4   :  { %v1641_v48 = vld [vmem:[%s4375_s5 + $0x2f8] sm:$0xff]  ;;  %v2865_v51 = vcombine.high %v1636_v24, %v1640_v44  ;;  %v2864_v60 = vcombine.low %v1636_v24, %v1640_v44 }
 0x1f5   :  { %v2867_v52 = vcombine.high %v1637_v45, %v1641_v48  ;;  %v2866_v61 = vcombine.low %v1637_v45, %v1641_v48  ;;  %v3179_v45 = vld [vmem:[%s4374_s1 + $0x8] sm:$0xff] }
 0x1f6   :  { %2445 = vmatpush1.bf16.msra.mxu0 %v2800_v53  ;;  %2486 = vmatpush1.bf16.msra.mxu1 %v2802_v54  ;;  %v1644_v53 = vld [vmem:[%s4375_s5 + $0x310] sm:$0xff] }
 0x1f7   :  { %2446 = vmatprep.subr.bf16.mxu0 %v2809_v55  ;;  %2487 = vmatprep.subr.bf16.mxu1 %v2811_v59  ;;  %v1648_v54 = vld [vmem:[%s4375_s5 + $0x330] sm:$0xff]  ;;  %v1645_v55 = vld [vmem:[%s4375_s5 + $0x318] sm:$0xff] }
 0x1f8   :  { %v1649_v59 = vld [vmem:[%s4375_s5 + $0x338] sm:$0xff]  ;;  %v2873_v62 = vcombine.high %v1644_v53, %v1648_v54  ;;  %v2872_v6 = vcombine.low %v1644_v53, %v1648_v54 }
 0x1f9   :  { %v2875_v63 = vcombine.high %v1645_v55, %v1649_v59  ;;  %v2874_v7 = vcombine.low %v1645_v55, %v1649_v59 }
 0x1fa   :  { %2447 = vmatpush1.bf16.msra.mxu0 %v2808_v0  ;;  %2488 = vmatpush1.bf16.msra.mxu1 %v2810_v3  ;;  %v1652_v0 = vld [vmem:[%s4375_s5 + $0x350] sm:$0xff] }
 0x1fb   :  { %2448 = vmatprep.subr.bf16.mxu0 %v2817_v4  ;;  %2489 = vmatprep.subr.bf16.mxu1 %v2819_v5  ;;  %v1656_v3 = vld [vmem:[%s4375_s5 + $0x370] sm:$0xff]  ;;  %v1653_v4 = vld [vmem:[%s4375_s5 + $0x358] sm:$0xff] }
 0x1fc   :  { %v1657_v5 = vld [vmem:[%s4375_s5 + $0x378] sm:$0xff]  ;;  %v2881_v8 = vcombine.high %v1652_v0, %v1656_v3  ;;  %v2880_v15 = vcombine.low %v1652_v0, %v1656_v3  ;;  %v4315_v3 = vpop.permute.xlu0 %2577 }
 0x1fd   :  { %v2883_v9 = vcombine.high %v1653_v4, %v1657_v5  ;;  %v2882_v16 = vcombine.low %v1653_v4, %v1657_v5 }
 0x1fe   :  { %2449 = vmatpush1.bf16.msra.mxu0 %v2816_v10  ;;  %2490 = vmatpush1.bf16.msra.mxu1 %v2818_v11  ;;  %v1660_v10 = vld [vmem:[%s4375_s5 + $0x390] sm:$0xff] }
 0x1ff   :  { %2450 = vmatprep.subr.bf16.mxu0 %v2825_v2  ;;  %2491 = vmatprep.subr.bf16.mxu1 %v2827_v14  ;;  %v1664_v11 = vld [vmem:[%s4375_s5 + $0x3b0] sm:$0xff]  ;;  %v1661_v2 = vld [vmem:[%s4375_s5 + $0x398] sm:$0xff] }
 0x200   :  { %v1665_v14 = vld [vmem:[%s4375_s5 + $0x3b8] sm:$0xff]  ;;  %v2889_v17 = vcombine.high %v1660_v10, %v1664_v11  ;;  %v2888_v22 = vcombine.low %v1660_v10, %v1664_v11 }
 0x201   :  { %v2891_v19 = vcombine.high %v1661_v2, %v1665_v14  ;;  %v2890_v23 = vcombine.low %v1661_v2, %v1665_v14 }
 0x202   :  { %2451 = vmatpush1.bf16.msra.mxu0 %v2824_v47  ;;  %2492 = vmatpush1.bf16.msra.mxu1 %v2826_v56  ;;  %v1668_v47 = vld [vmem:[%s4375_s5 + $0x3d0] sm:$0xff] }
 0x203   :  { %2452 = vmatprep.subr.bf16.mxu0 %v2833_v20  ;;  %2493 = vmatprep.subr.bf16.mxu1 %v2835_v21  ;;  %v1672_v56 = vld [vmem:[%s4375_s5 + $0x3f0] sm:$0xff]  ;;  %v1669_v20 = vld [vmem:[%s4375_s5 + $0x3d8] sm:$0xff] }
 0x204   :  { %v1673_v21 = vld [vmem:[%s4375_s5 + $0x3f8] sm:$0xff]  ;;  %v2897_v57 = vcombine.high %v1668_v47, %v1672_v56 }
 0x205   :  { %v2899_v25 = vcombine.high %v1669_v20, %v1673_v21 }
 0x206   :  { %2453 = vmatpush1.bf16.msra.mxu0 %v2832_v26  ;;  %2494 = vmatpush1.bf16.msra.mxu1 %v2834_v27  ;;  %v2896_v26 = vcombine.low %v1668_v47, %v1672_v56  ;;  %v2898_v27 = vcombine.low %v1669_v20, %v1673_v21  ;;  %v1694_v47 = vsub.s32 4, %v4087_v12  ;;  %v1702_v56 = vsub.s32 6, %v4087_v12 }
 0x207   :  { %2454 = vmatprep.subr.bf16.mxu0 %v2841_v28  ;;  %2495 = vmatprep.subr.bf16.mxu1 %v2843_v29  ;;  %v1686_v28 = vsub.s32 2, %v4087_v12  ;;  %v4288_v29 = vld [vmem:[%s4377_s6] sm:$0xff]  ;;  %v1698_v20 = vsub.s32 5, %v4087_v12  ;;  %v1706_v21 = vsub.s32 7, %v4087_v12 }
 0x208   :  { %v1679_v31 = vrot.slane %v4288_v29, %v1532_v13  ;;  %v1683_v34 = vrot.slane %v4288_v29, %v1536_v18  ;;  %v3177_v13 = vld [vmem:[%s4374_s1] sm:$0xff]  ;;  %v3178_v18 = vld [vmem:[%s4374_s1 + $0x10] sm:$0xff] }
 0x209   :  { %v1687_v33 = vrot.slane %v4288_v29, %v1686_v28  ;;  %v3181_v12 = vld [vmem:[%s4374_s1 + $0x20] sm:$0xff] }
 0x20a   :  { %2455 = vmatpush1.bf16.msra.mxu0 %v2840_v35  ;;  %2496 = vmatpush1.bf16.msra.mxu1 %v2842_v39 }
 0x20b   :  { %2456 = vmatprep.subr.bf16.mxu0 %v2849_v36  ;;  %2497 = vmatprep.subr.bf16.mxu1 %v2851_v58 }
 0x20e   :  { %2457 = vmatpush1.bf16.msra.mxu0 %v2848_v41  ;;  %2498 = vmatpush1.bf16.msra.mxu1 %v2850_v42 }
 0x20f   :  { %2458 = vmatprep.subr.bf16.mxu0 %v2857_v43  ;;  %2499 = vmatprep.subr.bf16.mxu1 %v2859_v1 }
 0x212   :  { %2459 = vmatpush1.bf16.msra.mxu0 %v2856_v49  ;;  %2500 = vmatpush1.bf16.msra.mxu1 %v2858_v50  ;;  %v3180_v49 = vld [vmem:[%s4374_s1 + $0x18] sm:$0xff] }
 0x213   :  { %2460 = vmatprep.subr.bf16.mxu0 %v2865_v51  ;;  %2501 = vmatprep.subr.bf16.mxu1 %v2867_v52 }
 0x216   :  { %2461 = vmatpush1.bf16.msra.mxu0 %v2864_v60  ;;  %2502 = vmatpush1.bf16.msra.mxu1 %v2866_v61 }
 0x217   :  { %2462 = vmatprep.subr.bf16.mxu0 %v2873_v62  ;;  %2503 = vmatprep.subr.bf16.mxu1 %v2875_v63 }
 0x21a   :  { %2463 = vmatpush1.bf16.msra.mxu0 %v2872_v6  ;;  %2504 = vmatpush1.bf16.msra.mxu1 %v2874_v7 }
 0x21b   :  { %2464 = vmatprep.subr.bf16.mxu0 %v2881_v8  ;;  %2505 = vmatprep.subr.bf16.mxu1 %v2883_v9 }
 0x21e   :  { %2465 = vmatpush1.bf16.msra.mxu0 %v2880_v15  ;;  %2506 = vmatpush1.bf16.msra.mxu1 %v2882_v16 }
 0x21f   :  { %2466 = vmatprep.subr.bf16.mxu0 %v2889_v17  ;;  %2507 = vmatprep.subr.bf16.mxu1 %v2891_v19 }
 0x222   :  { %2467 = vmatpush1.bf16.msra.mxu0 %v2888_v22  ;;  %2508 = vmatpush1.bf16.msra.mxu1 %v2890_v23  ;;  %v1695_v22 = vrot.slane %v4288_v29, %v1694_v47  ;;  %v1703_v23 = vrot.slane %v4288_v29, %v1702_v56 }
 0x223   :  { %2468 = vmatprep.subr.bf16.mxu0 %v2897_v57  ;;  %2509 = vmatprep.subr.bf16.mxu1 %v2899_v25  ;;  %v1699_v57 = vrot.slane %v4288_v29, %v1698_v20  ;;  %v1707_v25 = vrot.slane %v4288_v29, %v1706_v21 }
 0x226   :  { %2469 = vmatpush1.bf16.msra.mxu0 %v2896_v26  ;;  %2510 = vmatpush1.bf16.msra.mxu1 %v2898_v27 }
 0x229   :  { %2471 = vmatmul.mubr.bf16.vlgmr.msra.gmra.mrb[16].mxu0 %v4110_v32  ;;  %2512 = vmatmul.mubr.bf16.vlgmr.msra.gmra.mrb[16].mxu1 %v4110_v32  ;;  %v1691_v32 = vrot.slane %v4288_v29, %v1690_v30 }
 0x2bc   :  { %v2390_v35 = vpop.f32.mrb[12].mxu0  ;;  %v2431_v39 = vpop.f32.mrb[12].mxu1 }
 0x2bd   :  { %v2391_v36 = vadd.f32 %v2390_v35, %v1679_v31  ;;  %v2432_v58 = vadd.f32 %v2431_v39, %v1687_v33  ;;  %v2392_v37 = vpop.f32.mrb[13].mxu0  ;;  %v2433_v38 = vpop.f32.mrb[13].mxu1 }
 0x2be   :  { %v2393_v46 = vadd.f32 %v2392_v37, %v1683_v34  ;;  %v2434_v40 = vadd.f32 %v2433_v38, %v1691_v32  ;;  %v2394_v41 = vpop.f32.mrb[14].mxu0  ;;  %v2435_v42 = vpop.f32.mrb[14].mxu1 }
 0x2bf   :  { %v2520_v43 = vsub.f32 %v3177_v13, %v2391_v36  ;;  %v2522_v1 = vsub.f32 %v3178_v18, %v2432_v58  ;;  %v2395_v24 = vpop.f32.mrb[15].mxu0  ;;  %v2436_v44 = vpop.f32.mrb[15].mxu1  ;;  %v3182_v58 = vld [vmem:[%s4374_s1 + $0x30] sm:$0xff]  ;;  %v3184_v41 = vld [vmem:[%s4374_s1 + $0x38] sm:$0xff] }
 0x2c0   :  { %v2521_v48 = vsub.f32 %v3179_v45, %v2393_v46  ;;  %v2523_v50 = vsub.f32 %v3180_v49, %v2434_v40  ;;  %v3183_v46 = vld [vmem:[%s4374_s1 + $0x28] sm:$0xff] }
 0x2c1   :  { %v2528_v51 = vand.u32 2147483647, %v2520_v43  ;;  %v2544_v52 = vmul.f32 0.5, %v2520_v43  ;;  %v2530_v53 = vand.u32 2147483647, %v2522_v1  ;;  %v2546_v54 = vmul.f32 0.5, %v2522_v1 }
 0x2c2   :  { %v2529_v55 = vand.u32 2147483647, %v2521_v48  ;;  %v2545_v59 = vmul.f32 0.5, %v2521_v48  ;;  %v2531_v60 = vand.u32 2147483647, %v2523_v50  ;;  %v2547_v61 = vmul.f32 0.5, %v2523_v50 }
 0x2c3   :  { %vm4311_vm0 = vcmp.lt.f32.partialorder %v2528_v51, 1.0  ;;  %v2552_v63 = vmul.f32 %v2544_v52, %v2520_v43  ;;  %v2900_v0 = vadd.f32 -0.5, %v2528_v51  ;;  %vm2538_vm4 = vcmp.lt.f32.partialorder %v2530_v53, 1.0 }
 0x2c4   :  { %v2554_v4 = vmul.f32 %v2546_v54, %v2522_v1  ;;  %v2902_v5 = vadd.f32 -0.5, %v2530_v53  ;;  %vm2537_vm5 = vcmp.lt.f32.partialorder %v2529_v55, 1.0  ;;  %v2553_v6 = vmul.f32 %v2545_v59, %v2521_v48 }
 0x2c5   :  { %v2568_v7 = vsel %vm4311_vm0, %v2552_v63, %v2900_v0  ;;  %v2901_v8 = vadd.f32 -0.5, %v2529_v55  ;;  %vm2539_vm6 = vcmp.lt.f32.partialorder %v2531_v60, 1.0  ;;  %v2555_v9 = vmul.f32 %v2547_v61, %v2523_v50 }
 0x2c6   :  { %v2570_v10 = vsel %vm2538_vm4, %v2554_v4, %v2902_v5  ;;  %v2903_v11 = vadd.f32 -0.5, %v2531_v60  ;;  %v2580_v2 = vmul.f32 %v4315_v3, %v2568_v7 }
 0x2c7   :  { %v2569_v14 = vsel %vm2537_vm5, %v2553_v6, %v2901_v8  ;;  %v2582_v15 = vmul.f32 %v4315_v3, %v2570_v10 }
 0x2c8   :  { %v2571_v16 = vsel %vm2539_vm6, %v2555_v9, %v2903_v11  ;;  %v2581_v17 = vmul.f32 %v4315_v3, %v2569_v14  ;;  %2588 = vst [vmem:[%s4378_s7] sm:$0xff] %v2580_v2 }
 0x2c9   :  { %v2583_v19 = vmul.f32 %v4315_v3, %v2571_v16  ;;  %2590 = vst [vmem:[%s4378_s7 + $0x10] sm:$0xff] %v2582_v15 }
 0x2ca   :  { %2589 = vst [vmem:[%s4378_s7 + $0x8] sm:$0xff] %v2581_v17 }
 0x2cb   :  { %2591 = vst [vmem:[%s4378_s7 + $0x18] sm:$0xff] %v2583_v19 }
 0x2fc   :  { %v2472_v26 = vpop.f32.mrb[16].mxu0  ;;  %v2513_v27 = vpop.f32.mrb[16].mxu1 }
 0x2fd   :  { %v2473_v28 = vadd.f32 %v2472_v26, %v1695_v22  ;;  %v2514_v30 = vadd.f32 %v2513_v27, %v1703_v23  ;;  %v2474_v31 = vpop.f32.mrb[17].mxu0  ;;  %v2515_v33 = vpop.f32.mrb[17].mxu1 }
 0x2fe   :  { %v2475_v34 = vadd.f32 %v2474_v31, %v1699_v57  ;;  %v2516_v32 = vadd.f32 %v2515_v33, %v1707_v25  ;;  %v2476_v35 = vpop.f32.mrb[18].mxu0  ;;  %v2517_v39 = vpop.f32.mrb[18].mxu1 }
 0x2ff   :  { %v2524_v36 = vsub.f32 %v3181_v12, %v2473_v28  ;;  %v2526_v29 = vsub.f32 %v3182_v58, %v2514_v30  ;;  %v2477_v37 = vpop.f32.mrb[19].mxu0  ;;  %v2518_v38 = vpop.f32.mrb[19].mxu1 }
 0x300   :  { %v2525_v40 = vsub.f32 %v3183_v46, %v2475_v34  ;;  %v2527_v42 = vsub.f32 %v3184_v41, %v2516_v32 }
 0x301   :  { %v2532_v13 = vand.u32 2147483647, %v2524_v36  ;;  %v2548_v43 = vmul.f32 0.5, %v2524_v36  ;;  %v2534_v18 = vand.u32 2147483647, %v2526_v29  ;;  %v2550_v1 = vmul.f32 0.5, %v2526_v29 }
 0x302   :  { %v2533_v24 = vand.u32 2147483647, %v2525_v40  ;;  %v2549_v44 = vmul.f32 0.5, %v2525_v40  ;;  %v2535_v45 = vand.u32 2147483647, %v2527_v42  ;;  %v2551_v48 = vmul.f32 0.5, %v2527_v42 }
 0x303   :  { %vm2540_vm7 = vcmp.lt.f32.partialorder %v2532_v13, 1.0  ;;  %v2556_v49 = vmul.f32 %v2548_v43, %v2524_v36  ;;  %v2904_v50 = vadd.f32 -0.5, %v2532_v13  ;;  %vm2542_vm8 = vcmp.lt.f32.partialorder %v2534_v18, 1.0 }
 0x304   :  { %v2558_v51 = vmul.f32 %v2550_v1, %v2526_v29  ;;  %v2906_v52 = vadd.f32 -0.5, %v2534_v18  ;;  %vm2541_vm9 = vcmp.lt.f32.partialorder %v2533_v24, 1.0  ;;  %v2557_v53 = vmul.f32 %v2549_v44, %v2525_v40 }
 0x305   :  { %v2572_v54 = vsel %vm2540_vm7, %v2556_v49, %v2904_v50  ;;  %v2905_v55 = vadd.f32 -0.5, %v2533_v24  ;;  %vm2543_vm10 = vcmp.lt.f32.partialorder %v2535_v45, 1.0  ;;  %v2559_v59 = vmul.f32 %v2551_v48, %v2527_v42 }
 0x306   :  { %v2584_v60 = vmul.f32 %v4315_v3, %v2572_v54  ;;  %v2574_v61 = vsel %vm2542_vm8, %v2558_v51, %v2906_v52  ;;  %v2907_v62 = vadd.f32 -0.5, %v2535_v45 }
 0x307   :  { %v2586_v63 = vmul.f32 %v4315_v3, %v2574_v61  ;;  %v2573_v0 = vsel %vm2541_vm9, %v2557_v53, %v2905_v55 }
 0x308   :  { %2592 = vst [vmem:[%s4378_s7 + $0x20] sm:$0xff] %v2584_v60  ;;  %v2585_v4 = vmul.f32 %v4315_v3, %v2573_v0  ;;  %v2575_v5 = vsel %vm2543_vm10, %v2559_v59, %v2907_v62 }
 0x309   :  { %2594 = vst [vmem:[%s4378_s7 + $0x30] sm:$0xff] %v2586_v63  ;;  %v2587_v6 = vmul.f32 %v4315_v3, %v2575_v5 }
 0x30a   :  { %2593 = vst [vmem:[%s4378_s7 + $0x28] sm:$0xff] %v2585_v4 }
 0x30b   :  { %2595 = vst [vmem:[%s4378_s7 + $0x38] sm:$0xff] %v2587_v6 }

</bundles_post_ra>
